<compile_context>
chip_gen: v5e
topology: v5e:2x2
jax: 0.10.0
libtpu: 0.0.40
codegen_flags: <defaults>
</compile_context>

<pallas_src>
import jax
import jax.numpy as jnp
from jax.experimental import pallas as pl
from jax.experimental.pallas import tpu as pltpu


def _sigmoid(x):
    # Exact logistic: 1 / (1 + exp(-x)).  exp runs on the EUP; the divide is cheap here.
    return 1.0 / (1.0 + jnp.exp(-x))


def _mlp_kernel(x_ref, w1_ref, b1_ref, w2_ref, b2_ref, w3_ref, b3_ref, o_ref):
    # One batch tile per grid step; weights/biases are the same full-extent VMEM block
    # every step (index_map always returns (0, 0)), so they stay resident.
    x = x_ref[...]
    h1 = jnp.dot(x, w1_ref[...], preferred_element_type=jnp.float32) + b1_ref[...]
    h1 = _sigmoid(h1)
    h2 = jnp.dot(h1, w2_ref[...], preferred_element_type=jnp.float32) + b2_ref[...]
    h2 = _sigmoid(h2)
    out = jnp.dot(h2, w3_ref[...], preferred_element_type=jnp.float32) + b3_ref[...]
    o_ref[...] = out.astype(o_ref.dtype)


def _round_up(n, m):
    return ((n + m - 1) // m) * m


def _num_tensorcores():
    # v7x has 2 TensorCores per chip; v5e/v6e have 1.  Best-effort detection.
    try:
        kind = jax.devices()[0].device_kind.lower()
        return 2 if "v7" in kind else 1
    except Exception:  # pragma: no cover - conservative fallback
        return 1


def mlp_forward(x, w1, b1, w2, b2, w3, b3, *, block_b=None, max_block_b=2048):
    """Fused MLP forward. x: (B, inputs); w_i: (fan_in, fan_out); b_i: (1, fan_out)."""
    B, f_in = x.shape
    h1 = w1.shape[1]
    h2 = w2.shape[1]
    outputs = w3.shape[1]

    if block_b is None:
        # One tile per TensorCore (1 on v5e/v6e, 2 on v7x); cap tile rows for VMEM.
        n_tiles = _num_tensorcores()
        block_b = _round_up(max(pl.cdiv(B, n_tiles), 8), 8)
        block_b = min(block_b, max_block_b)
    block_b = max(8, _round_up(block_b, 8))

    # Only the batch axis is ever padded, and only when B % block_b != 0.
    b_pad = _round_up(B, block_b)
    nb = b_pad // block_b
    x_in = x if b_pad == B else jnp.pad(x, ((0, b_pad - B), (0, 0)))

    resident = lambda shape: pl.BlockSpec(shape, lambda i: (0, 0))

    # Cost estimate from true (unpadded) dims.
    flops = 2 * B * (f_in * h1 + h1 * h2 + h2 * outputs)
    transcendentals = B * (h1 + h2)
    bytes_accessed = 4 * (
        B * f_in + B * outputs
        + f_in * h1 + h1 * h2 + h2 * outputs
        + h1 + h2 + outputs
    )

    out = pl.pallas_call(
        _mlp_kernel,
        out_shape=jax.ShapeDtypeStruct((b_pad, outputs), x.dtype),
        grid=(nb,),
        in_specs=[
            pl.BlockSpec((block_b, f_in), lambda i: (i, 0)),
            resident((f_in, h1)), resident((1, h1)),
            resident((h1, h2)), resident((1, h2)),
            resident((h2, outputs)), resident((1, outputs)),
        ],
        out_specs=pl.BlockSpec((block_b, outputs), lambda i: (i, 0)),
        compiler_params=pltpu.CompilerParams(
            dimension_semantics=("parallel",),
        ),
        cost_estimate=pl.CostEstimate(
            flops=flops,
            transcendentals=transcendentals,
            bytes_accessed=bytes_accessed,
        ),
    )(x_in, w1, b1, w2, b2, w3, b3)

    return out if b_pad == B else out[:B]


def init_params(key, inputs, hidden_1, hidden_2, outputs):
    # Deterministic init mimicking nn.Linear's U(-1/sqrt(fan_in), 1/sqrt(fan_in)).
    ks = jax.random.split(key, 6)

    def lin(kw, kb, fan_in, fan_out):
        bound = 1.0 / jnp.sqrt(fan_in)
        w = jax.random.uniform(kw, (fan_in, fan_out), jnp.float32, -bound, bound)
        b = jax.random.uniform(kb, (1, fan_out), jnp.float32, -bound, bound)
        return w, b

    w1, b1 = lin(ks[0], ks[1], inputs, hidden_1)
    w2, b2 = lin(ks[2], ks[3], hidden_1, hidden_2)
    w3, b3 = lin(ks[4], ks[5], hidden_2, outputs)
    return w1, b1, w2, b2, w3, b3


if __name__ == "__main__":
    inputs, hidden_1, hidden_2, outputs = 32, 64, 64, 16
    batch = 256

    key = jax.random.PRNGKey(0)
    kx, kp = jax.random.split(key)
    x = jax.random.normal(kx, (batch, inputs), jnp.float32)
    params = init_params(kp, inputs, hidden_1, hidden_2, outputs)

    y = mlp_forward(x, *params)
    jax.block_until_ready(y)

    # Reference check in plain JAX.
    w1, b1, w2, b2, w3, b3 = params
    h1 = jax.nn.sigmoid(x @ w1 + b1)
    h2 = jax.nn.sigmoid(h1 @ w2 + b2)
    y_ref = h2 @ w3 + b3

    assert y.shape == (batch, outputs)
    assert jnp.allclose(y, y_ref, atol=1e-5, rtol=1e-5), float(jnp.max(jnp.abs(y - y_ref)))

    print("KERNEL_OK")
</pallas_src>

<mosaic_0001>
module attributes {stable_mosaic.version = 11 : i64} {
  func.func @_mlp_kernel(%arg0: i32, %arg1: memref<256x32xf32, #tpu.memory_space<vmem>>, %arg2: memref<32x64xf32, #tpu.memory_space<vmem>>, %arg3: memref<1x64xf32, #tpu.memory_space<vmem>>, %arg4: memref<64x64xf32, #tpu.memory_space<vmem>>, %arg5: memref<1x64xf32, #tpu.memory_space<vmem>>, %arg6: memref<64x16xf32, #tpu.memory_space<vmem>>, %arg7: memref<1x16xf32, #tpu.memory_space<vmem>>, %arg8: memref<256x16xf32, #tpu.memory_space<vmem>>) attributes {dimension_semantics = [#tpu.dimension_semantics<parallel>], iteration_bounds = array<i64: 1>, scalar_prefetch = 0 : i64, scratch_operands = 0 : i64, tpu.core_type = #tpu.core_type<tc>, window_params = [{transform_indices = @transform_0, window_bounds = array<i64: 256, 32>}, {pipeline_mode = #tpu.pipeline_mode<synchronous>, transform_indices = @transform_1, window_bounds = array<i64: 32, 64>}, {pipeline_mode = #tpu.pipeline_mode<synchronous>, transform_indices = @transform_2, window_bounds = array<i64: 1, 64>}, {pipeline_mode = #tpu.pipeline_mode<synchronous>, transform_indices = @transform_3, window_bounds = array<i64: 64, 64>}, {pipeline_mode = #tpu.pipeline_mode<synchronous>, transform_indices = @transform_4, window_bounds = array<i64: 1, 64>}, {pipeline_mode = #tpu.pipeline_mode<synchronous>, transform_indices = @transform_5, window_bounds = array<i64: 64, 16>}, {pipeline_mode = #tpu.pipeline_mode<synchronous>, transform_indices = @transform_6, window_bounds = array<i64: 1, 16>}, {transform_indices = @transform_7, window_bounds = array<i64: 256, 16>}]} {
    %c0 = arith.constant 0 : index
    %c0_0 = arith.constant 0 : index
    %0 = vector.load %arg1[%c0, %c0_0] : memref<256x32xf32, #tpu.memory_space<vmem>>, vector<256x32xf32>
    %c0_1 = arith.constant 0 : index
    %c0_2 = arith.constant 0 : index
    %1 = vector.load %arg2[%c0_1, %c0_2] : memref<32x64xf32, #tpu.memory_space<vmem>>, vector<32x64xf32>
    %cst = arith.constant dense<0.000000e+00> : vector<256x64xf32>
    %2 = tpu.matmul %0, %1, %cst {dimension_numbers = #tpu.dot_dimension_numbers<[1], [0], [0], [1], [0, 0, 1, 1], [], []>} : vector<256x32xf32>, vector<32x64xf32>, vector<256x64xf32> -> vector<256x64xf32>
    %c0_3 = arith.constant 0 : index
    %c0_4 = arith.constant 0 : index
    %3 = vector.load %arg3[%c0_3, %c0_4] : memref<1x64xf32, #tpu.memory_space<vmem>>, vector<1x64xf32>
    %4 = vector.broadcast %3 : vector<1x64xf32> to vector<256x64xf32>
    %5 = arith.addf %2, %4 : vector<256x64xf32>
    %cst_5 = arith.constant 0.000000e+00 : f32
    %6 = vector.broadcast %cst_5 : f32 to vector<256x64xf32>
    %7 = arith.subf %6, %5 : vector<256x64xf32>
    %8 = math.exp %7 : vector<256x64xf32>
    %cst_6 = arith.constant 1.000000e+00 : f32
    %9 = vector.broadcast %cst_6 : f32 to vector<256x64xf32>
    %10 = arith.addf %9, %8 : vector<256x64xf32>
    %cst_7 = arith.constant 1.000000e+00 : f32
    %11 = vector.broadcast %cst_7 : f32 to vector<256x64xf32>
    %12 = arith.divf %11, %10 : vector<256x64xf32>
    %c0_8 = arith.constant 0 : index
    %c0_9 = arith.constant 0 : index
    %13 = vector.load %arg4[%c0_8, %c0_9] : memref<64x64xf32, #tpu.memory_space<vmem>>, vector<64x64xf32>
    %cst_10 = arith.constant dense<0.000000e+00> : vector<256x64xf32>
    %14 = tpu.matmul %12, %13, %cst_10 {dimension_numbers = #tpu.dot_dimension_numbers<[1], [0], [0], [1], [0, 0, 1, 1], [], []>} : vector<256x64xf32>, vector<64x64xf32>, vector<256x64xf32> -> vector<256x64xf32>
    %c0_11 = arith.constant 0 : index
    %c0_12 = arith.constant 0 : index
    %15 = vector.load %arg5[%c0_11, %c0_12] : memref<1x64xf32, #tpu.memory_space<vmem>>, vector<1x64xf32>
    %16 = vector.broadcast %15 : vector<1x64xf32> to vector<256x64xf32>
    %17 = arith.addf %14, %16 : vector<256x64xf32>
    %cst_13 = arith.constant 0.000000e+00 : f32
    %18 = vector.broadcast %cst_13 : f32 to vector<256x64xf32>
    %19 = arith.subf %18, %17 : vector<256x64xf32>
    %20 = math.exp %19 : vector<256x64xf32>
    %cst_14 = arith.constant 1.000000e+00 : f32
    %21 = vector.broadcast %cst_14 : f32 to vector<256x64xf32>
    %22 = arith.addf %21, %20 : vector<256x64xf32>
    %cst_15 = arith.constant 1.000000e+00 : f32
    %23 = vector.broadcast %cst_15 : f32 to vector<256x64xf32>
    %24 = arith.divf %23, %22 : vector<256x64xf32>
    %c0_16 = arith.constant 0 : index
    %c0_17 = arith.constant 0 : index
    %25 = vector.load %arg6[%c0_16, %c0_17] : memref<64x16xf32, #tpu.memory_space<vmem>>, vector<64x16xf32>
    %cst_18 = arith.constant dense<0.000000e+00> : vector<256x16xf32>
    %26 = tpu.matmul %24, %25, %cst_18 {dimension_numbers = #tpu.dot_dimension_numbers<[1], [0], [0], [1], [0, 0, 1, 1], [], []>} : vector<256x64xf32>, vector<64x16xf32>, vector<256x16xf32> -> vector<256x16xf32>
    %c0_19 = arith.constant 0 : index
    %c0_20 = arith.constant 0 : index
    %27 = vector.load %arg7[%c0_19, %c0_20] : memref<1x16xf32, #tpu.memory_space<vmem>>, vector<1x16xf32>
    %28 = vector.broadcast %27 : vector<1x16xf32> to vector<256x16xf32>
    %29 = arith.addf %26, %28 : vector<256x16xf32>
    %c0_21 = arith.constant 0 : index
    %c0_22 = arith.constant 0 : index
    %30 = vector.load %arg8[%c0_21, %c0_22] : memref<256x16xf32, #tpu.memory_space<vmem>>, vector<256x16xf32>
    tpu.vector_store %arg8[%c0_21, %c0_22], %29 {strides = array<i32>} : memref<256x16xf32, #tpu.memory_space<vmem>>, vector<256x16xf32>,
    return
  }
  func.func @transform_0(%arg0: i32) -> (i32, i32) {
    %c0_i32 = arith.constant 0 : i32
    %c0_i32_0 = arith.constant 0 : i32
    return %arg0, %c0_i32 : i32, i32
  }
  func.func @transform_1(%arg0: i32) -> (i32, i32) {
    %c0_i32 = arith.constant 0 : i32
    %c0_i32_0 = arith.constant 0 : i32
    %c0_i32_1 = arith.constant 0 : i32
    return %c0_i32, %c0_i32_0 : i32, i32
  }
  func.func @transform_2(%arg0: i32) -> (i32, i32) {
    %c0_i32 = arith.constant 0 : i32
    %c0_i32_0 = arith.constant 0 : i32
    %c0_i32_1 = arith.constant 0 : i32
    return %c0_i32, %c0_i32_0 : i32, i32
  }
  func.func @transform_3(%arg0: i32) -> (i32, i32) {
    %c0_i32 = arith.constant 0 : i32
    %c0_i32_0 = arith.constant 0 : i32
    %c0_i32_1 = arith.constant 0 : i32
    return %c0_i32, %c0_i32_0 : i32, i32
  }
  func.func @transform_4(%arg0: i32) -> (i32, i32) {
    %c0_i32 = arith.constant 0 : i32
    %c0_i32_0 = arith.constant 0 : i32
    %c0_i32_1 = arith.constant 0 : i32
    return %c0_i32, %c0_i32_0 : i32, i32
  }
  func.func @transform_5(%arg0: i32) -> (i32, i32) {
    %c0_i32 = arith.constant 0 : i32
    %c0_i32_0 = arith.constant 0 : i32
    %c0_i32_1 = arith.constant 0 : i32
    return %c0_i32, %c0_i32_0 : i32, i32
  }
  func.func @transform_6(%arg0: i32) -> (i32, i32) {
    %c0_i32 = arith.constant 0 : i32
    %c0_i32_0 = arith.constant 0 : i32
    %c0_i32_1 = arith.constant 0 : i32
    return %c0_i32, %c0_i32_0 : i32, i32
  }
  func.func @transform_7(%arg0: i32) -> (i32, i32) {
    %c0_i32 = arith.constant 0 : i32
    %c0_i32_0 = arith.constant 0 : i32
    return %arg0, %c0_i32 : i32, i32
  }
}

</mosaic_0001>

<bundles_post_ra>
// kernel: tpu_custom_call.1
= control target key start
LH: loop header
LB: loop body
LE: loop exit
PB: predicated region body
PF: predicated region fallthrough
CT: control target
= control target key end

     0   :  { %vm66_vm0 = vcmask 261120   ;;  %vm896_vm4 = vcmask 523264   ;;  %s3510_s1 = inlined_call_operand.vmem [shape: f32[32,64], index: 1, kind: input, shape index: {}]   ;;  %s3511_s0 = inlined_call_operand.vmem [shape: f32[256,32], index: 0, kind: input, shape index: {}]   ;;  %s3512_s2 = inlined_call_operand.vmem [shape: f32[1,64], index: 2, kind: input, shape index: {}]   ;;  %s3513_s3 = inlined_call_operand.vmem [shape: f32[64,64], index: 3, kind: input, shape index: {}]   ;;  %s3514_s4 = inlined_call_operand.vmem [shape: f32[1,64], index: 4, kind: input, shape index: {}]   ;;  %s3515_s5 = inlined_call_operand.vmem [shape: f32[64,16], index: 5, kind: input, shape index: {}]   ;;  %s3516_s6 = inlined_call_operand.vmem [shape: f32[1,16], index: 6, kind: input, shape index: {}]   ;;  %s3517_s7 = inlined_call_operand.vmem [shape: f32[256,16], index: 7, kind: output, shape index: {}]  }
   0x1   :  { %v61_v0 = vld [vmem:[%s3510_s1 + $0x18] sm:$0xff]  ;;  %v60_v1 = vld [vmem:[%s3510_s1 + $0x10] sm:$0xff]  ;;  %v59_v2 = vld [vmem:[%s3510_s1 + $0x8] sm:$0xff] }
   0x2   :  { %175 = vmatpush.msra.mxu0 %v61_v0  ;;  %2068 = vmatpush.msra.mxu3 %v61_v0  ;;  %v58_v3 = vld [vmem:[%s3510_s1] sm:$0xff]  ;;  %v27_v5 = vld [vmem:[%s3511_s0 + $0x8] sm:$0xff]  ;;  %v28_v6 = vld [vmem:[%s3511_s0 + $0x10] sm:$0xff] }
   0x3   :  { %v26_v4 = vld [vmem:[%s3511_s0] sm:$0xff]  ;;  %v29_v7 = vld [vmem:[%s3511_s0 + $0x18] sm:$0xff]  ;;  %v31_v9 = vld [vmem:[%s3511_s0 + $0x28] sm:$0xff] }
   0x4   :  { %176 = vmatpush.msra.mxu0 %v60_v1  ;;  %2069 = vmatpush.msra.mxu3 %v60_v1  ;;  %v30_v8 = vld [vmem:[%s3511_s0 + $0x20] sm:$0xff]  ;;  %v32_v10 = vld [vmem:[%s3511_s0 + $0x30] sm:$0xff]  ;;  %v33_v11 = vld [vmem:[%s3511_s0 + $0x38] sm:$0xff] }
   0x5   :  { %v34_v12 = vld [vmem:[%s3511_s0 + $0x40] sm:$0xff]  ;;  %v35_v13 = vld [vmem:[%s3511_s0 + $0x48] sm:$0xff]  ;;  %v36_v14 = vld [vmem:[%s3511_s0 + $0x50] sm:$0xff] }
   0x6   :  { %177 = vmatpush.msra.mxu0 %v59_v2  ;;  %2070 = vmatpush.msra.mxu3 %v59_v2  ;;  %v37_v15 = vld [vmem:[%s3511_s0 + $0x58] sm:$0xff]  ;;  %v38_v16 = vld [vmem:[%s3511_s0 + $0x60] sm:$0xff]  ;;  %v39_v17 = vld [vmem:[%s3511_s0 + $0x68] sm:$0xff] }
   0x7   :  { %v40_v18 = vld [vmem:[%s3511_s0 + $0x70] sm:$0xff]  ;;  %v891_v19 = vld [vmem:[%s3513_s3 + $0x38] sm:$0xff]  ;;  %v889_v21 = vld [vmem:[%s3513_s3 + $0x28] sm:$0xff] }
   0x8   :  { %178 = vmatpush.msra.mxu0 %v58_v3  ;;  %2071 = vmatpush.msra.mxu3 %v58_v3  ;;  %v890_v20 = vld [vmem:[%s3513_s3 + $0x30] sm:$0xff]  ;;  %v888_v22 = vld [vmem:[%s3513_s3 + $0x20] sm:$0xff]  ;;  %v41_v23 = vld [vmem:[%s3511_s0 + $0x78] sm:$0xff] }
   0x9   :  { %1972 = vmatmul.msk.f32.vlgmr.msra.gmra.mxu0 %vm66_vm0, %v26_v4  ;;  %1001 = vmatpush.msra.mxu1 %v891_v19  ;;  %v887_v24 = vld [vmem:[%s3513_s3 + $0x18] sm:$0xff]  ;;  %v886_v25 = vld [vmem:[%s3513_s3 + $0x10] sm:$0xff]  ;;  %v2486_v26 = vld [vmem:[%s3512_s2] ss:$0 sm:$0xff] }
   0xa   :  { %2072 = vmatpush.msrb.mxu3 %v891_v19  ;;  %v885_v27 = vld [vmem:[%s3513_s3 + $0x8] sm:$0xff]  ;;  %v884_v28 = vld [vmem:[%s3513_s3] sm:$0xff]  ;;  %v44_v42 = vld [vmem:[%s3511_s0 + $0x90] sm:$0xff] }
   0xb   :  { %1002 = vmatpush.msra.mxu1 %v890_v20  ;;  %v42_v30 = vld [vmem:[%s3511_s0 + $0x80] sm:$0xff]  ;;  %v43_v35 = vld [vmem:[%s3511_s0 + $0x88] sm:$0xff]  ;;  %v45_v51 = vld [vmem:[%s3511_s0 + $0x98] sm:$0xff] }
   0xc   :  { %2073 = vmatpush.msrb.mxu3 %v890_v20  ;;  %v51_v52 = vld [vmem:[%s3511_s0 + $0xc8] sm:$0xff] }
   0xd   :  { %1003 = vmatpush.msra.mxu1 %v889_v21  ;;  %1997 = vmatmul.msk.f32.vlgmr.msra.gmra.mxu3 %vm66_vm0, %v51_v52 }
   0xe   :  { %2074 = vmatpush.msrb.mxu3 %v889_v21 }
   0xf   :  { %1004 = vmatpush.msra.mxu1 %v888_v22 }
  0x10   :  { %2075 = vmatpush.msrb.mxu3 %v888_v22 }
  0x11   :  { %1973 = vmatmul.msk.f32.gmra.mxu0 %vm66_vm0, %v27_v5  ;;  %1005 = vmatpush.msra.mxu1 %v887_v24  ;;  %v46_v5 = vld [vmem:[%s3511_s0 + $0xa0] sm:$0xff] }
  0x12   :  { %2076 = vmatpush.msrb.mxu3 %v887_v24  ;;  %v53_v24 = vld [vmem:[%s3511_s0 + $0xd8] sm:$0xff] }
  0x13   :  { %1006 = vmatpush.msra.mxu1 %v886_v25 }
  0x14   :  { %2077 = vmatpush.msrb.mxu3 %v886_v25 }
  0x15   :  { %1007 = vmatpush.msra.mxu1 %v885_v27 }
  0x16   :  { %2078 = vmatpush.msrb.mxu3 %v885_v27 }
  0x17   :  { %1008 = vmatpush.msra.mxu1 %v884_v28 }
  0x18   :  { %2079 = vmatpush.msrb.mxu3 %v884_v28 }
  0x19   :  { %1974 = vmatmul.msk.f32.gmra.mxu0 %vm66_vm0, %v28_v6  ;;  %v52_v6 = vld [vmem:[%s3511_s0 + $0xd0] sm:$0xff] }
  0x1a   :  { %1998 = vmatmul.msk.f32.gmra.mxu3 %vm66_vm0, %v52_v6 }
  0x21   :  { %1975 = vmatmul.msk.f32.gmra.mxu0 %vm66_vm0, %v29_v7 }
  0x22   :  { %1999 = vmatmul.msk.f32.gmra.mxu3 %vm66_vm0, %v53_v24 }
  0x29   :  { %1976 = vmatmul.msk.f32.gmra.mxu0 %vm66_vm0, %v30_v8 }
  0x31   :  { %1977 = vmatmul.msk.f32.gmra.mxu0 %vm66_vm0, %v31_v9 }
  0x39   :  { %1978 = vmatmul.msk.f32.gmra.mxu0 %vm66_vm0, %v32_v10 }
  0x41   :  { %1979 = vmatmul.msk.f32.gmra.mxu0 %vm66_vm0, %v33_v11 }
  0x49   :  { %1980 = vmatmul.msk.f32.gmra.mxu0 %vm66_vm0, %v34_v12 }
  0x51   :  { %1981 = vmatmul.msk.f32.gmra.mxu0 %vm66_vm0, %v35_v13 }
  0x59   :  { %1982 = vmatmul.msk.f32.gmra.mxu0 %vm66_vm0, %v36_v14 }
  0x61   :  { %1983 = vmatmul.msk.f32.gmra.mxu0 %vm66_vm0, %v37_v15 }
  0x69   :  { %1984 = vmatmul.msk.f32.gmra.mxu0 %vm66_vm0, %v38_v16 }
  0x71   :  { %1985 = vmatmul.msk.f32.gmra.mxu0 %vm66_vm0, %v39_v17 }
  0x79   :  { %1986 = vmatmul.msk.f32.gmra.mxu0 %vm66_vm0, %v40_v18 }
  0x81   :  { %1987 = vmatmul.msk.f32.gmra.mxu0 %vm66_vm0, %v41_v23  ;;  %v47_v23 = vld [vmem:[%s3511_s0 + $0xa8] sm:$0xff] }
  0x86   :  { %v180_v29 = vpop.f32.mrf.mxu0 }
  0x87   :  { %v181_v31 = vadd.f32 %v2486_v26, %v180_v29 }
  0x89   :  { %v276_v32 = vsub.f32 0.0, %v181_v31  ;;  %1988 = vmatmul.msk.f32.gmra.mxu0 %vm66_vm0, %v42_v30 }
  0x8b   :  { %v308_v33 = vmul.f32 1.442695, %v276_v32 }
  0x8d   :  { %2091 = vpow2.f32 %v308_v33 }
  0x8e   :  { %v183_v34 = vpop.f32.mrf.mxu0 }
  0x8f   :  { %v184_v36 = vadd.f32 %v2486_v26, %v183_v34 }
  0x91   :  { %v277_v37 = vsub.f32 0.0, %v184_v36  ;;  %1989 = vmatmul.msk.f32.gmra.mxu0 %vm66_vm0, %v43_v35 }
  0x93   :  { %v2092_v38 = vpop.eup %2091  ;;  %v310_v39 = vmul.f32 1.442695, %v277_v37 }
  0x94   :  { %v372_v40 = vadd.f32 1.0, %v2092_v38 }
  0x95   :  { %2093 = vpow2.f32 %v310_v39 }
  0x96   :  { %2095 = vrcp.f32 %v372_v40  ;;  %v186_v41 = vpop.f32.mrf.mxu0  ;;  %v415_v55 = vand.u32 2147483648, %v372_v40  ;;  %v413_v58 = vand.u32 2147483647, %v372_v40  ;;  %vm409_vm2 = vweird.f32 %v372_v40 }
  0x97   :  { %v187_v43 = vadd.f32 %v2486_v26, %v186_v41 }
  0x98   :  { %v416_v0 = vor.u32 1.1754944e-38, %v415_v55  ;;  %vm414_vm5 = vcmp.eq.f32.partialorder %v413_v58, 8.507059e+37 }
  0x99   :  { %v278_v44 = vsub.f32 0.0, %v187_v43  ;;  %1990 = vmatmul.msk.f32.gmra.mxu0 %vm66_vm0, %v44_v42  ;;  %v48_v42 = vld [vmem:[%s3511_s0 + $0xb0] sm:$0xff]  ;;  %v54_v43 = vld [vmem:[%s3511_s0 + $0xe0] sm:$0xff] }
  0x9a   :  { %2000 = vmatmul.msk.f32.gmra.mxu3 %vm66_vm0, %v54_v43 }
  0x9b   :  { %v2094_v45 = vpop.eup %2093  ;;  %v312_v46 = vmul.f32 1.442695, %v278_v44 }
  0x9c   :  { %v2096_v47 = vpop.eup %2095  ;;  %v373_v48 = vadd.f32 1.0, %v2094_v45 }
  0x9d   :  { %2097 = vpow2.f32 %v312_v46  ;;  %v405_v49 = vmul.f32 %v2096_v47, %v372_v40  ;;  %vm410_vm1 = vweird.f32 %v2096_v47 }
  0x9e   :  { %2099 = vrcp.f32 %v373_v48  ;;  %v189_v50 = vpop.f32.mrf.mxu0  ;;  %vm411_vm3 = vmor %vm409_vm2, %vm410_vm1  ;;  %v430_v9 = vand.u32 2147483648, %v373_v48  ;;  %v428_v12 = vand.u32 2147483647, %v373_v48  ;;  %vm424_vm7 = vweird.f32 %v373_v48 }
  0x9f   :  { %v190_v53 = vadd.f32 %v2486_v26, %v189_v50  ;;  %v406_v54 = vsub.f32 1.0, %v405_v49 }
  0xa0   :  { %v431_v18 = vor.u32 1.1754944e-38, %v430_v9  ;;  %vm429_vm9 = vcmp.eq.f32.partialorder %v428_v12, 8.507059e+37 }
  0xa1   :  { %v279_v56 = vsub.f32 0.0, %v190_v53  ;;  %1991 = vmatmul.msk.f32.gmra.mxu0 %vm66_vm0, %v45_v51  ;;  %v407_v57 = vmul.f32 %v2096_v47, %v406_v54 }
  0xa3   :  { %v2098_v59 = vpop.eup %2097  ;;  %v314_v60 = vmul.f32 1.442695, %v279_v56  ;;  %v408_v61 = vadd.f32 %v2096_v47, %v407_v57 }
  0xa4   :  { %v2100_v62 = vpop.eup %2099  ;;  %v374_v63 = vadd.f32 1.0, %v2098_v59 }
  0xa5   :  { %2101 = vpow2.f32 %v314_v60  ;;  %v412_v1 = vsel %vm411_vm3, %v2096_v47, %v408_v61  ;;  %v420_v2 = vmul.f32 %v2100_v62, %v373_v48  ;;  %vm425_vm6 = vweird.f32 %v2100_v62  ;;  %v49_v60 = vld [vmem:[%s3511_s0 + $0xb8] sm:$0xff]  ;;  %v55_v61 = vld [vmem:[%s3511_s0 + $0xe8] sm:$0xff] }
  0xa6   :  { %2103 = vrcp.f32 %v374_v63  ;;  %v192_v3 = vpop.f32.mrf.mxu0  ;;  %v417_v4 = vsel %vm414_vm5, %v416_v0, %v412_v1  ;;  %vm426_vm8 = vmor %vm424_vm7, %vm425_vm6  ;;  %v445_v28 = vand.u32 2147483648, %v374_v63  ;;  %v443_v31 = vand.u32 2147483647, %v374_v63  ;;  %2001 = vmatmul.msk.f32.gmra.mxu3 %vm66_vm0, %v55_v61 }
  0xa7   :  { %v193_v7 = vadd.f32 %v2486_v26, %v192_v3  ;;  %2004 = vmatmul.msk.f32.vlgmr.msra.gmra.mxu1 %vm896_vm4, %v417_v4  ;;  %v421_v8 = vsub.f32 1.0, %v420_v2  ;;  %vm439_vm11 = vweird.f32 %v374_v63 }
  0xa8   :  { %v446_v37 = vor.u32 1.1754944e-38, %v445_v28  ;;  %vm444_vm13 = vcmp.eq.f32.partialorder %v443_v31, 8.507059e+37 }
  0xa9   :  { %v280_v10 = vsub.f32 0.0, %v193_v7  ;;  %1992 = vmatmul.msk.f32.gmra.mxu0 %vm66_vm0, %v46_v5  ;;  %v422_v11 = vmul.f32 %v2100_v62, %v421_v8 }
  0xab   :  { %v2102_v13 = vpop.eup %2101  ;;  %v316_v14 = vmul.f32 1.442695, %v280_v10  ;;  %v423_v15 = vadd.f32 %v2100_v62, %v422_v11 }
  0xac   :  { %v2104_v16 = vpop.eup %2103  ;;  %v375_v17 = vadd.f32 1.0, %v2102_v13 }
  0xad   :  { %2105 = vpow2.f32 %v316_v14  ;;  %v427_v19 = vsel %vm426_vm8, %v2100_v62, %v423_v15  ;;  %v435_v20 = vmul.f32 %v2104_v16, %v374_v63  ;;  %vm440_vm10 = vweird.f32 %v2104_v16  ;;  %v50_v14 = vld [vmem:[%s3511_s0 + $0xc0] sm:$0xff]  ;;  %v56_v15 = vld [vmem:[%s3511_s0 + $0xf0] sm:$0xff] }
  0xae   :  { %2107 = vrcp.f32 %v375_v17  ;;  %v195_v21 = vpop.f32.mrf.mxu0  ;;  %v432_v22 = vsel %vm429_vm9, %v431_v18, %v427_v19  ;;  %vm441_vm12 = vmor %vm439_vm11, %vm440_vm10  ;;  %v460_v46 = vand.u32 2147483648, %v375_v17  ;;  %v458_v49 = vand.u32 2147483647, %v375_v17  ;;  %2002 = vmatmul.msk.f32.gmra.mxu3 %vm66_vm0, %v56_v15 }
  0xaf   :  { %v196_v25 = vadd.f32 %v2486_v26, %v195_v21  ;;  %2005 = vmatmul.msk.f32.gmra.mxu1 %vm896_vm4, %v432_v22  ;;  %v436_v27 = vsub.f32 1.0, %v435_v20  ;;  %vm454_vm15 = vweird.f32 %v375_v17 }
  0xb0   :  { %v461_v55 = vor.u32 1.1754944e-38, %v460_v46  ;;  %vm459_vm2 = vcmp.eq.f32.partialorder %v458_v49, 8.507059e+37 }
  0xb1   :  { %v281_v29 = vsub.f32 0.0, %v196_v25  ;;  %1993 = vmatmul.msk.f32.gmra.mxu0 %vm66_vm0, %v47_v23  ;;  %v437_v30 = vmul.f32 %v2104_v16, %v436_v27 }
  0xb3   :  { %v2106_v32 = vpop.eup %2105  ;;  %v318_v33 = vmul.f32 1.442695, %v281_v29  ;;  %v438_v34 = vadd.f32 %v2104_v16, %v437_v30 }
  0xb4   :  { %v2108_v35 = vpop.eup %2107  ;;  %v376_v36 = vadd.f32 1.0, %v2106_v32 }
  0xb5   :  { %2109 = vpow2.f32 %v318_v33  ;;  %v442_v38 = vsel %vm441_vm12, %v2104_v16, %v438_v34  ;;  %v450_v39 = vmul.f32 %v2108_v35, %v375_v17  ;;  %vm455_vm14 = vweird.f32 %v2108_v35  ;;  %v57_v33 = vld [vmem:[%s3511_s0 + $0xf8] sm:$0xff] }
  0xb6   :  { %2111 = vrcp.f32 %v376_v36  ;;  %v198_v40 = vpop.f32.mrf.mxu0  ;;  %v447_v41 = vsel %vm444_vm13, %v446_v37, %v442_v38  ;;  %vm456_vm1 = vmor %vm454_vm15, %vm455_vm14  ;;  %v475_v0 = vand.u32 2147483648, %v376_v36  ;;  %v473_v3 = vand.u32 2147483647, %v376_v36  ;;  %2003 = vmatmul.msk.f32.gmra.mxu3 %vm66_vm0, %v57_v33 }
  0xb7   :  { %v199_v44 = vadd.f32 %v2486_v26, %v198_v40  ;;  %2006 = vmatmul.msk.f32.gmra.mxu1 %vm896_vm4, %v447_v41  ;;  %v451_v45 = vsub.f32 1.0, %v450_v39  ;;  %vm469_vm5 = vweird.f32 %v376_v36 }
  0xb8   :  { %v476_v9 = vor.u32 1.1754944e-38, %v475_v0  ;;  %vm474_vm7 = vcmp.eq.f32.partialorder %v473_v3, 8.507059e+37 }
  0xb9   :  { %v282_v47 = vsub.f32 0.0, %v199_v44  ;;  %1994 = vmatmul.msk.f32.gmra.mxu0 %vm66_vm0, %v48_v42  ;;  %v452_v48 = vmul.f32 %v2108_v35, %v451_v45 }
  0xbb   :  { %v2110_v50 = vpop.eup %2109  ;;  %v320_v51 = vmul.f32 1.442695, %v282_v47  ;;  %v453_v52 = vadd.f32 %v2108_v35, %v452_v48 }
  0xbc   :  { %v2112_v53 = vpop.eup %2111  ;;  %v377_v54 = vadd.f32 1.0, %v2110_v50 }
  0xbd   :  { %2113 = vpow2.f32 %v320_v51  ;;  %v457_v56 = vsel %vm456_vm1, %v2108_v35, %v453_v52  ;;  %v465_v57 = vmul.f32 %v2112_v53, %v376_v36  ;;  %vm470_vm3 = vweird.f32 %v2112_v53 }
  0xbe   :  { %2115 = vrcp.f32 %v377_v54  ;;  %v201_v58 = vpop.f32.mrf.mxu0  ;;  %v462_v59 = vsel %vm459_vm2, %v461_v55, %v457_v56  ;;  %vm471_vm6 = vmor %vm469_vm5, %vm470_vm3  ;;  %v490_v18 = vand.u32 2147483648, %v377_v54  ;;  %v488_v21 = vand.u32 2147483647, %v377_v54 }
  0xbf   :  { %v202_v62 = vadd.f32 %v2486_v26, %v201_v58  ;;  %2007 = vmatmul.msk.f32.gmra.mxu1 %vm896_vm4, %v462_v59  ;;  %v466_v63 = vsub.f32 1.0, %v465_v57  ;;  %vm484_vm9 = vweird.f32 %v377_v54 }
  0xc0   :  { %v491_v28 = vor.u32 1.1754944e-38, %v490_v18  ;;  %vm489_vm11 = vcmp.eq.f32.partialorder %v488_v21, 8.507059e+37 }
  0xc1   :  { %v283_v1 = vsub.f32 0.0, %v202_v62  ;;  %1995 = vmatmul.msk.f32.gmra.mxu0 %vm66_vm0, %v49_v60  ;;  %v467_v2 = vmul.f32 %v2112_v53, %v466_v63 }
  0xc3   :  { %v2114_v4 = vpop.eup %2113  ;;  %v322_v5 = vmul.f32 1.442695, %v283_v1  ;;  %v468_v6 = vadd.f32 %v2112_v53, %v467_v2 }
  0xc4   :  { %v2116_v7 = vpop.eup %2115  ;;  %v378_v8 = vadd.f32 1.0, %v2114_v4 }
  0xc5   :  { %2117 = vpow2.f32 %v322_v5  ;;  %v472_v10 = vsel %vm471_vm6, %v2112_v53, %v468_v6  ;;  %v480_v11 = vmul.f32 %v2116_v7, %v377_v54  ;;  %vm485_vm8 = vweird.f32 %v2116_v7 }
  0xc6   :  { %2119 = vrcp.f32 %v378_v8  ;;  %v204_v12 = vpop.f32.mrf.mxu0  ;;  %v477_v13 = vsel %vm474_vm7, %v476_v9, %v472_v10  ;;  %vm486_vm10 = vmor %vm484_vm9, %vm485_vm8  ;;  %v505_v36 = vand.u32 2147483648, %v378_v8  ;;  %v503_v39 = vand.u32 2147483647, %v378_v8 }
  0xc7   :  { %v205_v16 = vadd.f32 %v2486_v26, %v204_v12  ;;  %2008 = vmatmul.msk.f32.gmra.mxu1 %vm896_vm4, %v477_v13  ;;  %v481_v17 = vsub.f32 1.0, %v480_v11  ;;  %vm499_vm13 = vweird.f32 %v378_v8 }
  0xc8   :  { %v506_v45 = vor.u32 1.1754944e-38, %v505_v36  ;;  %vm504_vm15 = vcmp.eq.f32.partialorder %v503_v39, 8.507059e+37 }
  0xc9   :  { %v284_v19 = vsub.f32 0.0, %v205_v16  ;;  %1996 = vmatmul.msk.f32.gmra.mxu0 %vm66_vm0, %v50_v14  ;;  %v482_v20 = vmul.f32 %v2116_v7, %v481_v17 }
  0xcb   :  { %v2118_v22 = vpop.eup %2117  ;;  %v324_v23 = vmul.f32 1.442695, %v284_v19  ;;  %v483_v24 = vadd.f32 %v2116_v7, %v482_v20 }
  0xcc   :  { %v2120_v25 = vpop.eup %2119  ;;  %v379_v27 = vadd.f32 1.0, %v2118_v22 }
  0xcd   :  { %2121 = vpow2.f32 %v324_v23  ;;  %v487_v29 = vsel %vm486_vm10, %v2116_v7, %v483_v24  ;;  %v495_v30 = vmul.f32 %v2120_v25, %v378_v8  ;;  %vm500_vm12 = vweird.f32 %v2120_v25 }
  0xce   :  { %2123 = vrcp.f32 %v379_v27  ;;  %v207_v31 = vpop.f32.mrf.mxu0  ;;  %v492_v32 = vsel %vm489_vm11, %v491_v28, %v487_v29  ;;  %vm501_vm14 = vmor %vm499_vm13, %vm500_vm12  ;;  %v520_v52 = vand.u32 2147483648, %v379_v27  ;;  %v518_v55 = vand.u32 2147483647, %v379_v27 }
  0xcf   :  { %v208_v34 = vadd.f32 %v2486_v26, %v207_v31  ;;  %2009 = vmatmul.msk.f32.gmra.mxu1 %vm896_vm4, %v492_v32  ;;  %v496_v35 = vsub.f32 1.0, %v495_v30  ;;  %vm514_vm1 = vweird.f32 %v379_v27 }
  0xd0   :  { %v521_v61 = vor.u32 1.1754944e-38, %v520_v52  ;;  %vm519_vm3 = vcmp.eq.f32.partialorder %v518_v55, 8.507059e+37 }
  0xd1   :  { %v285_v37 = vsub.f32 0.0, %v208_v34  ;;  %v497_v38 = vmul.f32 %v2120_v25, %v496_v35 }
  0xd3   :  { %v2122_v40 = vpop.eup %2121  ;;  %v326_v41 = vmul.f32 1.442695, %v285_v37  ;;  %v498_v42 = vadd.f32 %v2120_v25, %v497_v38 }
  0xd4   :  { %v2124_v43 = vpop.eup %2123  ;;  %v380_v44 = vadd.f32 1.0, %v2122_v40 }
  0xd5   :  { %2125 = vpow2.f32 %v326_v41  ;;  %v502_v46 = vsel %vm501_vm14, %v2120_v25, %v498_v42  ;;  %v510_v47 = vmul.f32 %v2124_v43, %v379_v27  ;;  %vm515_vm0 = vweird.f32 %v2124_v43 }
  0xd6   :  { %2127 = vrcp.f32 %v380_v44  ;;  %v210_v48 = vpop.f32.mrf.mxu0  ;;  %v507_v49 = vsel %vm504_vm15, %v506_v45, %v502_v46  ;;  %vm516_vm2 = vmor %vm514_vm1, %vm515_vm0  ;;  %v535_v4 = vand.u32 2147483648, %v380_v44  ;;  %v533_v7 = vand.u32 2147483647, %v380_v44 }
  0xd7   :  { %v211_v50 = vadd.f32 %v2486_v26, %v210_v48  ;;  %2010 = vmatmul.msk.f32.gmra.mxu1 %vm896_vm4, %v507_v49  ;;  %v511_v51 = vsub.f32 1.0, %v510_v47  ;;  %vm529_vm6 = vweird.f32 %v380_v44 }
  0xd8   :  { %v536_v13 = vor.u32 1.1754944e-38, %v535_v4  ;;  %vm534_vm8 = vcmp.eq.f32.partialorder %v533_v7, 8.507059e+37 }
  0xd9   :  { %v286_v53 = vsub.f32 0.0, %v211_v50  ;;  %v512_v54 = vmul.f32 %v2124_v43, %v511_v51 }
  0xdb   :  { %v2126_v56 = vpop.eup %2125  ;;  %v328_v57 = vmul.f32 1.442695, %v286_v53  ;;  %v513_v58 = vadd.f32 %v2124_v43, %v512_v54 }
  0xdc   :  { %v2128_v59 = vpop.eup %2127  ;;  %v381_v60 = vadd.f32 1.0, %v2126_v56 }
  0xdd   :  { %2129 = vpow2.f32 %v328_v57  ;;  %v517_v62 = vsel %vm516_vm2, %v2124_v43, %v513_v58  ;;  %v525_v63 = vmul.f32 %v2128_v59, %v380_v44  ;;  %vm530_vm5 = vweird.f32 %v2128_v59 }
  0xde   :  { %2131 = vrcp.f32 %v381_v60  ;;  %v213_v0 = vpop.f32.mrf.mxu0  ;;  %v522_v1 = vsel %vm519_vm3, %v521_v61, %v517_v62  ;;  %vm531_vm7 = vmor %vm529_vm6, %vm530_vm5  ;;  %v550_v20 = vand.u32 2147483648, %v381_v60  ;;  %v548_v23 = vand.u32 2147483647, %v381_v60 }
  0xdf   :  { %v214_v2 = vadd.f32 %v2486_v26, %v213_v0  ;;  %2011 = vmatmul.msk.f32.gmra.mxu1 %vm896_vm4, %v522_v1  ;;  %v526_v3 = vsub.f32 1.0, %v525_v63  ;;  %vm544_vm10 = vweird.f32 %v381_v60 }
  0xe0   :  { %v551_v30 = vor.u32 1.1754944e-38, %v550_v20  ;;  %vm549_vm12 = vcmp.eq.f32.partialorder %v548_v23, 8.507059e+37 }
  0xe1   :  { %v287_v5 = vsub.f32 0.0, %v214_v2  ;;  %v527_v6 = vmul.f32 %v2128_v59, %v526_v3 }
  0xe3   :  { %v2130_v8 = vpop.eup %2129  ;;  %v330_v9 = vmul.f32 1.442695, %v287_v5  ;;  %v528_v10 = vadd.f32 %v2128_v59, %v527_v6 }
  0xe4   :  { %v2132_v11 = vpop.eup %2131  ;;  %v382_v12 = vadd.f32 1.0, %v2130_v8 }
  0xe5   :  { %2133 = vpow2.f32 %v330_v9  ;;  %v532_v14 = vsel %vm531_vm7, %v2128_v59, %v528_v10  ;;  %v540_v15 = vmul.f32 %v2132_v11, %v381_v60  ;;  %vm545_vm9 = vweird.f32 %v2132_v11 }
  0xe6   :  { %2135 = vrcp.f32 %v382_v12  ;;  %v216_v16 = vpop.f32.mrf.mxu0  ;;  %v537_v17 = vsel %vm534_vm8, %v536_v13, %v532_v14  ;;  %vm546_vm11 = vmor %vm544_vm10, %vm545_vm9  ;;  %v565_v37 = vand.u32 2147483648, %v382_v12  ;;  %v563_v40 = vand.u32 2147483647, %v382_v12 }
  0xe7   :  { %v217_v18 = vadd.f32 %v2486_v26, %v216_v16  ;;  %2012 = vmatmul.msk.f32.gmra.mxu1 %vm896_vm4, %v537_v17  ;;  %v541_v19 = vsub.f32 1.0, %v540_v15  ;;  %vm559_vm14 = vweird.f32 %v382_v12 }
  0xe8   :  { %v566_v46 = vor.u32 1.1754944e-38, %v565_v37  ;;  %vm564_vm0 = vcmp.eq.f32.partialorder %v563_v40, 8.507059e+37 }
  0xe9   :  { %v288_v21 = vsub.f32 0.0, %v217_v18  ;;  %v542_v22 = vmul.f32 %v2132_v11, %v541_v19 }
  0xeb   :  { %v2134_v24 = vpop.eup %2133  ;;  %v332_v25 = vmul.f32 1.442695, %v288_v21  ;;  %v543_v27 = vadd.f32 %v2132_v11, %v542_v22 }
  0xec   :  { %v2136_v28 = vpop.eup %2135  ;;  %v383_v29 = vadd.f32 1.0, %v2134_v24 }
  0xed   :  { %2137 = vpow2.f32 %v332_v25  ;;  %v547_v31 = vsel %vm546_vm11, %v2132_v11, %v543_v27  ;;  %v555_v32 = vmul.f32 %v2136_v28, %v382_v12  ;;  %vm560_vm13 = vweird.f32 %v2136_v28 }
  0xee   :  { %2139 = vrcp.f32 %v383_v29  ;;  %v219_v33 = vpop.f32.mrf.mxu0  ;;  %v552_v34 = vsel %vm549_vm12, %v551_v30, %v547_v31  ;;  %vm561_vm15 = vmor %vm559_vm14, %vm560_vm13  ;;  %v580_v53 = vand.u32 2147483648, %v383_v29  ;;  %v578_v56 = vand.u32 2147483647, %v383_v29 }
  0xef   :  { %v220_v35 = vadd.f32 %v2486_v26, %v219_v33  ;;  %2013 = vmatmul.msk.f32.gmra.mxu1 %vm896_vm4, %v552_v34  ;;  %v556_v36 = vsub.f32 1.0, %v555_v32  ;;  %vm574_vm2 = vweird.f32 %v383_v29 }
  0xf0   :  { %v581_v62 = vor.u32 1.1754944e-38, %v580_v53  ;;  %vm579_vm5 = vcmp.eq.f32.partialorder %v578_v56, 8.507059e+37 }
  0xf1   :  { %v289_v38 = vsub.f32 0.0, %v220_v35  ;;  %v557_v39 = vmul.f32 %v2136_v28, %v556_v36 }
  0xf3   :  { %v2138_v41 = vpop.eup %2137  ;;  %v334_v42 = vmul.f32 1.442695, %v289_v38  ;;  %v558_v43 = vadd.f32 %v2136_v28, %v557_v39 }
  0xf4   :  { %v2140_v44 = vpop.eup %2139  ;;  %v384_v45 = vadd.f32 1.0, %v2138_v41 }
  0xf5   :  { %2141 = vpow2.f32 %v334_v42  ;;  %v562_v47 = vsel %vm561_vm15, %v2136_v28, %v558_v43  ;;  %v570_v48 = vmul.f32 %v2140_v44, %v383_v29  ;;  %vm575_vm1 = vweird.f32 %v2140_v44 }
  0xf6   :  { %2143 = vrcp.f32 %v384_v45  ;;  %v222_v49 = vpop.f32.mrf.mxu0  ;;  %v567_v50 = vsel %vm564_vm0, %v566_v46, %v562_v47  ;;  %vm576_vm3 = vmor %vm574_vm2, %vm575_vm1  ;;  %v595_v5 = vand.u32 2147483648, %v384_v45  ;;  %v593_v8 = vand.u32 2147483647, %v384_v45 }
  0xf7   :  { %v223_v51 = vadd.f32 %v2486_v26, %v222_v49  ;;  %2014 = vmatmul.msk.f32.gmra.mxu1 %vm896_vm4, %v567_v50  ;;  %v571_v52 = vsub.f32 1.0, %v570_v48  ;;  %vm589_vm7 = vweird.f32 %v384_v45 }
  0xf8   :  { %v596_v14 = vor.u32 1.1754944e-38, %v595_v5  ;;  %vm594_vm9 = vcmp.eq.f32.partialorder %v593_v8, 8.507059e+37  ;;  %v1718_v5 = vld [vmem:[%s3515_s5 + $0x20] sm:$0xff] }
  0xf9   :  { %v290_v54 = vsub.f32 0.0, %v223_v51  ;;  %v572_v55 = vmul.f32 %v2140_v44, %v571_v52  ;;  %v1721_v52 = vld [vmem:[%s3515_s5 + $0x38] sm:$0xff] }
  0xfa   :  { %1830 = vmatpush.msra.mxu2 %v1721_v52  ;;  %2080 = vmatpush.msra.mxu3 %v1721_v52 }
  0xfb   :  { %v2142_v57 = vpop.eup %2141  ;;  %v336_v58 = vmul.f32 1.442695, %v290_v54  ;;  %v573_v59 = vadd.f32 %v2140_v44, %v572_v55 }
  0xfc   :  { %v2144_v60 = vpop.eup %2143  ;;  %v385_v61 = vadd.f32 1.0, %v2142_v57 }
  0xfd   :  { %2145 = vpow2.f32 %v336_v58  ;;  %v577_v63 = vsel %vm576_vm3, %v2140_v44, %v573_v59  ;;  %v585_v0 = vmul.f32 %v2144_v60, %v384_v45  ;;  %vm590_vm6 = vweird.f32 %v2144_v60  ;;  %v1720_v59 = vld [vmem:[%s3515_s5 + $0x30] sm:$0xff] }
  0xfe   :  { %2147 = vrcp.f32 %v385_v61  ;;  %v225_v1 = vpop.f32.mrf.mxu0  ;;  %v582_v2 = vsel %vm579_vm5, %v581_v62, %v577_v63  ;;  %vm591_vm8 = vmor %vm589_vm7, %vm590_vm6  ;;  %v610_v21 = vand.u32 2147483648, %v385_v61  ;;  %v608_v24 = vand.u32 2147483647, %v385_v61  ;;  %1831 = vmatpush.msra.mxu2 %v1720_v59  ;;  %2081 = vmatpush.msra.mxu3 %v1720_v59  ;;  %v1719_v63 = vld [vmem:[%s3515_s5 + $0x28] sm:$0xff] }
  0xff   :  { %v226_v3 = vadd.f32 %v2486_v26, %v225_v1  ;;  %2015 = vmatmul.msk.f32.gmra.mxu1 %vm896_vm4, %v582_v2  ;;  %v586_v4 = vsub.f32 1.0, %v585_v0  ;;  %vm604_vm11 = vweird.f32 %v385_v61 }
 0x100   :  { %v611_v31 = vor.u32 1.1754944e-38, %v610_v21  ;;  %vm609_vm13 = vcmp.eq.f32.partialorder %v608_v24, 8.507059e+37  ;;  %1832 = vmatpush.msra.mxu2 %v1719_v63  ;;  %2082 = vmatpush.msra.mxu3 %v1719_v63  ;;  %v1715_v21 = vld [vmem:[%s3515_s5 + $0x8] sm:$0xff] }
 0x101   :  { %v291_v6 = vsub.f32 0.0, %v226_v3  ;;  %v587_v7 = vmul.f32 %v2144_v60, %v586_v4 }
 0x102   :  { %1833 = vmatpush.msra.mxu2 %v1718_v5  ;;  %2083 = vmatpush.msra.mxu3 %v1718_v5 }
 0x103   :  { %v2146_v9 = vpop.eup %2145  ;;  %v338_v10 = vmul.f32 1.442695, %v291_v6  ;;  %v588_v11 = vadd.f32 %v2144_v60, %v587_v7 }
 0x104   :  { %v2148_v12 = vpop.eup %2147  ;;  %v386_v13 = vadd.f32 1.0, %v2146_v9 }
 0x105   :  { %2149 = vpow2.f32 %v338_v10  ;;  %v592_v15 = vsel %vm591_vm8, %v2144_v60, %v588_v11  ;;  %v600_v16 = vmul.f32 %v2148_v12, %v385_v61  ;;  %vm605_vm10 = vweird.f32 %v2148_v12  ;;  %v1717_v10 = vld [vmem:[%s3515_s5 + $0x18] sm:$0xff] }
 0x106   :  { %2151 = vrcp.f32 %v386_v13  ;;  %v228_v17 = vpop.f32.mrf.mxu0  ;;  %v597_v18 = vsel %vm594_vm9, %v596_v14, %v592_v15  ;;  %vm606_vm12 = vmor %vm604_vm11, %vm605_vm10  ;;  %v625_v38 = vand.u32 2147483648, %v386_v13  ;;  %v623_v41 = vand.u32 2147483647, %v386_v13  ;;  %1834 = vmatpush.msra.mxu2 %v1717_v10  ;;  %2084 = vmatpush.msra.mxu3 %v1717_v10  ;;  %v2621_v14 = vld [vmem:[%s3514_s4] ss:$0 sm:$0xff] }
 0x107   :  { %v229_v19 = vadd.f32 %v2486_v26, %v228_v17  ;;  %2016 = vmatmul.msk.f32.gmra.mxu1 %vm896_vm4, %v597_v18  ;;  %v601_v20 = vsub.f32 1.0, %v600_v16  ;;  %vm619_vm15 = vweird.f32 %v386_v13  ;;  %v1716_v16 = vld [vmem:[%s3515_s5 + $0x10] sm:$0xff] }
 0x108   :  { %v626_v47 = vor.u32 1.1754944e-38, %v625_v38  ;;  %vm624_vm1 = vcmp.eq.f32.partialorder %v623_v41, 8.507059e+37  ;;  %1835 = vmatpush.msra.mxu2 %v1716_v16  ;;  %2085 = vmatpush.msra.mxu3 %v1716_v16 }
 0x109   :  { %v292_v22 = vsub.f32 0.0, %v229_v19  ;;  %v602_v23 = vmul.f32 %v2148_v12, %v601_v20  ;;  %v255_v20 = vpop.f32.mrf.mxu3 }
 0x10a   :  { %1836 = vmatpush.msra.mxu2 %v1715_v21  ;;  %2086 = vmatpush.msra.mxu3 %v1715_v21 }
 0x10b   :  { %v2150_v25 = vpop.eup %2149  ;;  %v340_v27 = vmul.f32 1.442695, %v292_v22  ;;  %v603_v28 = vadd.f32 %v2148_v12, %v602_v23 }
 0x10c   :  { %v2152_v29 = vpop.eup %2151  ;;  %v387_v30 = vadd.f32 1.0, %v2150_v25 }
 0x10d   :  { %2153 = vpow2.f32 %v340_v27  ;;  %v607_v32 = vsel %vm606_vm12, %v2148_v12, %v603_v28  ;;  %v615_v33 = vmul.f32 %v2152_v29, %v386_v13  ;;  %vm620_vm14 = vweird.f32 %v2152_v29 }
 0x10e   :  { %2155 = vrcp.f32 %v387_v30  ;;  %v231_v34 = vpop.f32.mrf.mxu0  ;;  %v612_v35 = vsel %vm609_vm13, %v611_v31, %v607_v32  ;;  %vm621_vm0 = vmor %vm619_vm15, %vm620_vm14  ;;  %v640_v55 = vand.u32 2147483648, %v387_v30  ;;  %v638_v58 = vand.u32 2147483647, %v387_v30  ;;  %v1714_v31 = vld [vmem:[%s3515_s5] sm:$0xff] }
 0x10f   :  { %v232_v36 = vadd.f32 %v2486_v26, %v231_v34  ;;  %2017 = vmatmul.msk.f32.gmra.mxu1 %vm896_vm4, %v612_v35  ;;  %v616_v37 = vsub.f32 1.0, %v615_v33  ;;  %vm634_vm3 = vweird.f32 %v387_v30  ;;  %v256_v27 = vadd.f32 %v2486_v26, %v255_v20  ;;  %1837 = vmatpush.msra.mxu2 %v1714_v31 }
 0x110   :  { %v641_v2 = vor.u32 1.1754944e-38, %v640_v55  ;;  %vm639_vm6 = vcmp.eq.f32.partialorder %v638_v58, 8.507059e+37  ;;  %2087 = vmatpush.msra.mxu3 %v1714_v31 }
 0x111   :  { %v293_v39 = vsub.f32 0.0, %v232_v36  ;;  %v617_v40 = vmul.f32 %v2152_v29, %v616_v37 }
 0x113   :  { %v2154_v42 = vpop.eup %2153  ;;  %v342_v43 = vmul.f32 1.442695, %v293_v39  ;;  %v618_v44 = vadd.f32 %v2152_v29, %v617_v40  ;;  %v301_v39 = vsub.f32 0.0, %v256_v27 }
 0x114   :  { %v2156_v45 = vpop.eup %2155  ;;  %v2590_v46 = vadd.f32 1.0, %v2154_v42 }
 0x115   :  { %2157 = vpow2.f32 %v342_v43  ;;  %v622_v48 = vsel %vm621_vm0, %v2152_v29, %v618_v44  ;;  %v630_v49 = vmul.f32 %v2156_v45, %v387_v30  ;;  %vm635_vm2 = vweird.f32 %v2156_v45 }
 0x116   :  { %2159 = vrcp.f32 %v2590_v46  ;;  %v234_v50 = vpop.f32.mrf.mxu0  ;;  %v627_v51 = vsel %vm624_vm1, %v626_v47, %v622_v48  ;;  %vm636_vm5 = vmor %vm634_vm3, %vm635_vm2  ;;  %v653_v11 = vand.u32 2147483647, %v2590_v46  ;;  %v655_v12 = vand.u32 2147483648, %v2590_v46 }
 0x117   :  { %v235_v53 = vadd.f32 %v2486_v26, %v234_v50  ;;  %2018 = vmatmul.msk.f32.gmra.mxu1 %vm896_vm4, %v627_v51  ;;  %v631_v54 = vsub.f32 1.0, %v630_v49  ;;  %vm649_vm8 = vweird.f32 %v2590_v46  ;;  %v358_v43 = vmul.f32 1.442695, %v301_v39 }
 0x118   :  { %vm654_vm10 = vcmp.eq.f32.partialorder %v653_v11, 8.507059e+37  ;;  %v656_v25 = vor.u32 1.1754944e-38, %v655_v12 }
 0x119   :  { %v294_v56 = vsub.f32 0.0, %v235_v53  ;;  %v632_v57 = vmul.f32 %v2156_v45, %v631_v54 }
 0x11b   :  { %v2158_v60 = vpop.eup %2157  ;;  %v344_v61 = vmul.f32 1.442695, %v294_v56  ;;  %v633_v62 = vadd.f32 %v2156_v45, %v632_v57  ;;  %v2653_v57 = vld [vmem:[%s3512_s2] ss:$0 sm:$0xff] }
 0x11c   :  { %v2160_v0 = vpop.eup %2159  ;;  %v2604_v1 = vadd.f32 1.0, %v2158_v60 }
 0x11d   :  { %2161 = vpow2.f32 %v344_v61  ;;  %v637_v3 = vsel %vm636_vm5, %v2156_v45, %v633_v62  ;;  %v645_v4 = vmul.f32 %v2160_v0, %v2590_v46  ;;  %vm650_vm7 = vweird.f32 %v2160_v0  ;;  %v258_v61 = vpop.f32.mrf.mxu3 }
 0x11e   :  { %2163 = vrcp.f32 %v2604_v1  ;;  %v237_v6 = vpop.f32.mrf.mxu0  ;;  %v642_v7 = vsel %vm639_vm6, %v641_v2, %v637_v3  ;;  %vm651_vm9 = vmor %vm649_vm8, %vm650_vm7  ;;  %v668_v37 = vand.u32 2147483647, %v2604_v1  ;;  %v670_v38 = vand.u32 2147483648, %v2604_v1 }
 0x11f   :  { %v238_v8 = vadd.f32 %v2486_v26, %v237_v6  ;;  %2019 = vmatmul.msk.f32.gmra.mxu1 %vm896_vm4, %v642_v7  ;;  %v646_v9 = vsub.f32 1.0, %v645_v4  ;;  %vm664_vm12 = vweird.f32 %v2604_v1  ;;  %v259_v5 = vadd.f32 %v2653_v57, %v258_v61 }
 0x120   :  { %vm669_vm14 = vcmp.eq.f32.partialorder %v668_v37, 8.507059e+37  ;;  %v671_v49 = vor.u32 1.1754944e-38, %v670_v38 }
 0x121   :  { %v295_v13 = vsub.f32 0.0, %v238_v8  ;;  %v647_v15 = vmul.f32 %v2160_v0, %v646_v9 }
 0x123   :  { %v2162_v17 = vpop.eup %2161  ;;  %v346_v18 = vmul.f32 1.442695, %v295_v13  ;;  %v648_v19 = vadd.f32 %v2160_v0, %v647_v15 }
 0x124   :  { %v2164_v22 = vpop.eup %2163  ;;  %v2630_v23 = vadd.f32 1.0, %v2162_v17  ;;  %v1010_v24 = vpop.f32.mrf.mxu1 }
 0x125   :  { %2165 = vpow2.f32 %v346_v18  ;;  %v1011_v28 = vadd.f32 %v2621_v14, %v1010_v24  ;;  %v652_v29 = vsel %vm651_vm9, %v2160_v0, %v648_v19  ;;  %v660_v30 = vmul.f32 %v2164_v22, %v2604_v1 }
 0x126   :  { %2167 = vrcp.f32 %v2630_v23  ;;  %v240_v32 = vpop.f32.mrf.mxu0  ;;  %v657_v33 = vsel %vm654_vm10, %v656_v25, %v652_v29  ;;  %vm665_vm11 = vweird.f32 %v2164_v22  ;;  %v683_v55 = vand.u32 2147483647, %v2630_v23 }
 0x127   :  { %v1106_v34 = vsub.f32 0.0, %v1011_v28  ;;  %v241_v35 = vadd.f32 %v2486_v26, %v240_v32  ;;  %2020 = vmatmul.msk.f32.gmra.mxu1 %vm896_vm4, %v657_v33  ;;  %v661_v36 = vsub.f32 1.0, %v660_v30  ;;  %vm666_vm13 = vmor %vm664_vm12, %vm665_vm11  ;;  %v685_v60 = vand.u32 2147483648, %v2630_v23 }
 0x128   :  { %vm679_vm0 = vweird.f32 %v2630_v23  ;;  %vm2661_vm1 = vcmp.eq.f32.partialorder %v683_v55, 8.507059e+37 }
 0x129   :  { %v1138_v40 = vmul.f32 1.442695, %v1106_v34  ;;  %v296_v41 = vsub.f32 0.0, %v241_v35  ;;  %v662_v42 = vmul.f32 %v2164_v22, %v661_v36  ;;  %v686_v9 = vor.u32 1.1754944e-38, %v685_v60 }
 0x12b   :  { %v2166_v44 = vpop.eup %2165  ;;  %2169 = vpow2.f32 %v1138_v40  ;;  %v348_v45 = vmul.f32 1.442695, %v296_v41  ;;  %v663_v46 = vadd.f32 %v2164_v22, %v662_v42 }
 0x12c   :  { %v2168_v26 = vpop.eup %2167  ;;  %v2644_v47 = vadd.f32 1.0, %v2166_v44  ;;  %v1013_v48 = vpop.f32.mrf.mxu1  ;;  %2171 = vpow2.f32 %v358_v43 }
 0x12d   :  { %2173 = vpow2.f32 %v348_v45  ;;  %v1014_v50 = vadd.f32 %v2621_v14, %v1013_v48  ;;  %v667_v51 = vsel %vm666_vm13, %v2164_v22, %v663_v46  ;;  %v675_v52 = vmul.f32 %v2168_v26, %v2630_v23 }
 0x12e   :  { %2175 = vrcp.f32 %v2644_v47  ;;  %v243_v53 = vpop.f32.mrf.mxu0  ;;  %v672_v54 = vsel %vm669_vm14, %v671_v49, %v667_v51  ;;  %vm680_vm15 = vweird.f32 %v2168_v26  ;;  %v698_v13 = vand.u32 2147483647, %v2644_v47 }
 0x12f   :  { %v1107_v56 = vsub.f32 0.0, %v1014_v50  ;;  %v244_v58 = vadd.f32 %v2653_v57, %v243_v53  ;;  %2021 = vmatmul.msk.f32.gmra.mxu1 %vm896_vm4, %v672_v54  ;;  %v676_v59 = vsub.f32 1.0, %v675_v52  ;;  %vm681_vm2 = vmor %vm679_vm0, %vm680_vm15  ;;  %v700_v15 = vand.u32 2147483648, %v2644_v47 }
 0x130   :  { %v302_v22 = vsub.f32 0.0, %v259_v5  ;;  %vm694_vm3 = vweird.f32 %v2644_v47  ;;  %vm2683_vm5 = vcmp.eq.f32.partialorder %v698_v13, 8.507059e+37 }
 0x131   :  { %v2170_v62 = vpop.eup %2169  ;;  %v1140_v63 = vmul.f32 1.442695, %v1107_v56  ;;  %v297_v0 = vsub.f32 0.0, %v244_v58  ;;  %v677_v1 = vmul.f32 %v2168_v26, %v676_v59  ;;  %v701_v29 = vor.u32 1.1754944e-38, %v700_v15 }
 0x132   :  { %v2172_v2 = vpop.eup %2171  ;;  %v2658_v3 = vadd.f32 1.0, %v2170_v62  ;;  %v360_v38 = vmul.f32 1.442695, %v302_v22 }
 0x133   :  { %v2174_v6 = vpop.eup %2173  ;;  %2177 = vpow2.f32 %v1140_v63  ;;  %v350_v7 = vmul.f32 1.442695, %v297_v0  ;;  %v678_v8 = vadd.f32 %v2168_v26, %v677_v1  ;;  %v2677_v21 = vadd.f32 1.0, %v2172_v2 }
 0x134   :  { %v2176_v10 = vpop.eup %2175  ;;  %2179 = vrcp.f32 %v2658_v3  ;;  %v2667_v11 = vadd.f32 1.0, %v2174_v6  ;;  %v1016_v12 = vpop.f32.mrf.mxu1  ;;  %v1243_v27 = vand.u32 2147483647, %v2658_v3  ;;  %v1245_v30 = vand.u32 2147483648, %v2658_v3 }
 0x135   :  { %2181 = vpow2.f32 %v350_v7  ;;  %v1017_v16 = vadd.f32 %v2621_v14, %v1016_v12  ;;  %v682_v17 = vsel %vm681_vm2, %v2168_v26, %v678_v8  ;;  %v690_v18 = vmul.f32 %v2176_v10, %v2644_v47 }
 0x136   :  { %2183 = vrcp.f32 %v2667_v11  ;;  %v246_v19 = vpop.f32.mrf.mxu0  ;;  %v687_v20 = vsel %vm2661_vm1, %v686_v9, %v682_v17  ;;  %vm695_vm6 = vweird.f32 %v2176_v10  ;;  %vm1239_vm7 = vweird.f32 %v2658_v3 }
 0x137   :  { %v1108_v23 = vsub.f32 0.0, %v1017_v16  ;;  %v247_v24 = vadd.f32 %v2653_v57, %v246_v19  ;;  %2022 = vmatmul.msk.f32.gmra.mxu1 %vm896_vm4, %v687_v20  ;;  %v691_v25 = vsub.f32 1.0, %v690_v18  ;;  %2185 = vrcp.f32 %v2677_v21  ;;  %vm696_vm9 = vmor %vm694_vm3, %vm695_vm6 }
 0x138   :  { %v713_v37 = vand.u32 2147483647, %v2667_v11  ;;  %vm2694_vm8 = vcmp.eq.f32.partialorder %v1243_v27, 8.507059e+37  ;;  %v1246_v26 = vor.u32 1.1754944e-38, %v1245_v30  ;;  %vm709_vm10 = vweird.f32 %v2667_v11 }
 0x139   :  { %v2178_v31 = vpop.eup %2177  ;;  %v1142_v32 = vmul.f32 1.442695, %v1108_v23  ;;  %v298_v33 = vsub.f32 0.0, %v247_v24  ;;  %v692_v34 = vmul.f32 %v2176_v10, %v691_v25  ;;  %v715_v48 = vand.u32 2147483648, %v2667_v11  ;;  %v261_v24 = vpop.f32.mrf.mxu3 }
 0x13a   :  { %v2180_v35 = vpop.eup %2179  ;;  %v2689_v36 = vadd.f32 1.0, %v2178_v31  ;;  %vm2718_vm12 = vcmp.eq.f32.partialorder %v713_v37, 8.507059e+37 }
 0x13b   :  { %v2182_v39 = vpop.eup %2181  ;;  %2187 = vpow2.f32 %v1142_v32  ;;  %v352_v40 = vmul.f32 1.442695, %v298_v33  ;;  %v693_v41 = vadd.f32 %v2176_v10, %v692_v34  ;;  %v1235_v42 = vmul.f32 %v2180_v35, %v2658_v3 }
 0x13c   :  { %v2698_v44 = vpop.eup %2183  ;;  %2189 = vrcp.f32 %v2689_v36  ;;  %v2701_v45 = vadd.f32 1.0, %v2182_v39  ;;  %v1019_v46 = vpop.f32.mrf.mxu1  ;;  %vm1240_vm11 = vweird.f32 %v2180_v35  ;;  %v716_v61 = vor.u32 1.1754944e-38, %v715_v48 }
 0x13d   :  { %2191 = vpow2.f32 %v352_v40  ;;  %v1020_v49 = vadd.f32 %v2621_v14, %v1019_v46  ;;  %v697_v50 = vsel %vm696_vm9, %v2176_v10, %v693_v41  ;;  %v1236_v51 = vsub.f32 1.0, %v1235_v42  ;;  %v2716_v58 = vpop.eup %2185  ;;  %vm1241_vm15 = vmor %vm1239_vm7, %vm1240_vm11 }
 0x13e   :  { %2193 = vrcp.f32 %v2701_v45  ;;  %v249_v52 = vpop.f32.mrf.mxu0  ;;  %v702_v53 = vsel %vm2683_vm5, %v701_v29, %v697_v50  ;;  %v705_v47 = vmul.f32 %v2698_v44, %v2667_v11  ;;  %v1258_v62 = vand.u32 2147483647, %v2689_v36 }
 0x13f   :  { %v1109_v54 = vsub.f32 0.0, %v1020_v49  ;;  %v250_v55 = vadd.f32 %v2653_v57, %v249_v52  ;;  %2023 = vmatmul.msk.f32.gmra.mxu1 %vm896_vm4, %v702_v53  ;;  %v1237_v56 = vmul.f32 %v2180_v35, %v1236_v51  ;;  %2195 = vpow2.f32 %v360_v38 }
 0x140   :  { %v706_v59 = vsub.f32 1.0, %v705_v47  ;;  %vm710_vm13 = vweird.f32 %v2698_v44  ;;  %vm1254_vm14 = vweird.f32 %v2689_v36  ;;  %v1260_v7 = vand.u32 2147483648, %v2689_v36 }
 0x141   :  { %v2188_v63 = vpop.eup %2187  ;;  %v1144_v0 = vmul.f32 1.442695, %v1109_v54  ;;  %v299_v1 = vsub.f32 0.0, %v250_v55  ;;  %v1238_v2 = vadd.f32 %v2180_v35, %v1237_v56  ;;  %v728_v8 = vand.u32 2147483647, %v2701_v45  ;;  %vm711_vm2 = vmor %vm709_vm10, %vm710_vm13 }
 0x142   :  { %v2725_v4 = vpop.eup %2189  ;;  %v2727_v5 = vadd.f32 1.0, %v2188_v63  ;;  %v707_v6 = vmul.f32 %v2698_v44, %v706_v59  ;;  %vm2737_vm0 = vcmp.eq.f32.partialorder %v1258_v62, 8.507059e+37  ;;  %vm724_vm1 = vweird.f32 %v2701_v45 }
 0x143   :  { %v2192_v9 = vpop.eup %2191  ;;  %2197 = vpow2.f32 %v1144_v0  ;;  %v354_v10 = vmul.f32 1.442695, %v299_v1  ;;  %v1242_v12 = vsel %vm1241_vm15, %v2180_v35, %v1238_v2  ;;  %v1250_v13 = vmul.f32 %v2725_v4, %v2689_v36  ;;  %v264_v1 = vpop.f32.mrf.mxu3 }
 0x144   :  { %v2741_v16 = vpop.eup %2193  ;;  %2199 = vrcp.f32 %v2727_v5  ;;  %v2744_v3 = vadd.f32 1.0, %v2192_v9  ;;  %v1022_v17 = vpop.f32.mrf.mxu1  ;;  %v1247_v18 = vsel %vm2694_vm8, %v1246_v26, %v1242_v12  ;;  %v708_v19 = vadd.f32 %v2698_v44, %v707_v6 }
 0x145   :  { %v2196_v20 = vpop.eup %2195  ;;  %2201 = vpow2.f32 %v354_v10  ;;  %v1023_v22 = vadd.f32 %v2621_v14, %v1022_v17  ;;  %2036 = vmatmul.msk.f32.vlgmr.msra.gmra.mxu2 %vm896_vm4, %v1247_v18  ;;  %v1251_v23 = vsub.f32 1.0, %v1250_v13  ;;  %vm1255_vm3 = vweird.f32 %v2725_v4 }
 0x146   :  { %2203 = vrcp.f32 %v2744_v3  ;;  %v252_v25 = vpop.f32.mrf.mxu0  ;;  %v712_v27 = vsel %vm711_vm2, %v2698_v44, %v708_v19  ;;  %v2759_v28 = vadd.f32 1.0, %v2196_v20  ;;  %v720_v29 = vmul.f32 %v2741_v16, %v2701_v45  ;;  %vm1256_vm6 = vmor %vm1254_vm14, %vm1255_vm3 }
 0x147   :  { %v1110_v30 = vsub.f32 0.0, %v1023_v22  ;;  %v253_v31 = vadd.f32 %v2653_v57, %v252_v25  ;;  %v717_v11 = vsel %vm2718_vm12, %v716_v61, %v712_v27  ;;  %v1252_v32 = vmul.f32 %v2725_v4, %v1251_v23 }
 0x148   :  { %2024 = vmatmul.msk.f32.gmra.mxu1 %vm896_vm4, %v717_v11  ;;  %2205 = vrcp.f32 %v2759_v28  ;;  %v1261_v33 = vor.u32 1.1754944e-38, %v1260_v7  ;;  %v721_v34 = vsub.f32 1.0, %v720_v29  ;;  %vm725_vm5 = vweird.f32 %v2741_v16 }
 0x149   :  { %v2198_v35 = vpop.eup %2197  ;;  %v1146_v37 = vmul.f32 1.442695, %v1110_v30  ;;  %v300_v38 = vsub.f32 0.0, %v253_v31  ;;  %v1253_v39 = vadd.f32 %v2725_v4, %v1252_v32  ;;  %v730_v40 = vand.u32 2147483648, %v2701_v45  ;;  %vm726_vm8 = vmor %vm724_vm1, %vm725_vm5 }
 0x14a   :  { %v2772_v41 = vpop.eup %2199  ;;  %v2774_v42 = vadd.f32 1.0, %v2198_v35  ;;  %v722_v43 = vmul.f32 %v2741_v16, %v721_v34  ;;  %vm2781_vm7 = vcmp.eq.f32.partialorder %v728_v8, 8.507059e+37  ;;  %v262_v46 = vadd.f32 %v2653_v57, %v261_v24 }
 0x14b   :  { %v2202_v26 = vpop.eup %2201  ;;  %2207 = vpow2.f32 %v1146_v37  ;;  %v356_v48 = vmul.f32 1.442695, %v300_v38  ;;  %v1257_v49 = vsel %vm1256_vm6, %v2725_v4, %v1253_v39  ;;  %v731_v50 = vor.u32 1.1754944e-38, %v730_v40 }
 0x14c   :  { %v2787_v51 = vpop.eup %2203  ;;  %2209 = vrcp.f32 %v2774_v42  ;;  %v2790_v36 = vadd.f32 1.0, %v2202_v26  ;;  %v1025_v52 = vpop.f32.mrf.mxu1  ;;  %v1262_v53 = vsel %vm2737_vm0, %v1261_v33, %v1257_v49  ;;  %v723_v47 = vadd.f32 %v2741_v16, %v722_v43 }
 0x14d   :  { %2211 = vpow2.f32 %v356_v48  ;;  %v1026_v54 = vadd.f32 %v2621_v14, %v1025_v52  ;;  %2037 = vmatmul.msk.f32.gmra.mxu2 %vm896_vm4, %v1262_v53  ;;  %v303_v55 = vsub.f32 0.0, %v262_v46  ;;  %v1265_v56 = vmul.f32 %v2772_v41, %v2727_v5 }
 0x14e   :  { %v2803_v59 = vpop.eup %2205  ;;  %2213 = vrcp.f32 %v2790_v36  ;;  %v727_v60 = vsel %vm726_vm8, %v2741_v16, %v723_v47  ;;  %vm1269_vm9 = vweird.f32 %v2727_v5  ;;  %v1273_v61 = vand.u32 2147483647, %v2727_v5 }
 0x14f   :  { %v1111_v62 = vsub.f32 0.0, %v1026_v54  ;;  %v732_v63 = vsel %vm2781_vm7, %v731_v50, %v727_v60  ;;  %v362_v45 = vmul.f32 1.442695, %v303_v55  ;;  %v1266_v0 = vsub.f32 1.0, %v1265_v56 }
 0x150   :  { %2025 = vmatmul.msk.f32.gmra.mxu1 %vm896_vm4, %v732_v63  ;;  %vm1270_vm10 = vweird.f32 %v2772_v41  ;;  %vm2813_vm11 = vcmp.eq.f32.partialorder %v1273_v61, 8.507059e+37  ;;  %v1275_v4 = vand.u32 2147483648, %v2727_v5  ;;  %v735_v6 = vmul.f32 %v2787_v51, %v2744_v3 }
 0x151   :  { %v2208_v7 = vpop.eup %2207  ;;  %v1148_v8 = vmul.f32 1.442695, %v1111_v62  ;;  %2215 = vpow2.f32 %v362_v45  ;;  %v1267_v9 = vmul.f32 %v2772_v41, %v1266_v0  ;;  %vm739_vm12 = vweird.f32 %v2744_v3  ;;  %vm1271_vm14 = vmor %vm1269_vm9, %vm1270_vm10 }
 0x152   :  { %v2822_v10 = vpop.eup %2209  ;;  %v2824_v12 = vadd.f32 1.0, %v2208_v7  ;;  %v736_v13 = vsub.f32 1.0, %v735_v6  ;;  %vm740_vm13 = vweird.f32 %v2787_v51  ;;  %v743_v15 = vand.u32 2147483647, %v2744_v3 }
 0x153   :  { %v2212_v16 = vpop.eup %2211  ;;  %2217 = vpow2.f32 %v1148_v8  ;;  %v1268_v17 = vadd.f32 %v2772_v41, %v1267_v9  ;;  %v745_v18 = vand.u32 2147483648, %v2744_v3  ;;  %v265_v19 = vadd.f32 %v2653_v57, %v264_v1  ;;  %vm741_vm0 = vmor %vm739_vm12, %vm740_vm13  ;;  %v267_v3 = vpop.f32.mrf.mxu3 }
 0x154   :  { %v2831_v20 = vpop.eup %2213  ;;  %2219 = vrcp.f32 %v2824_v12  ;;  %v2834_v22 = vadd.f32 1.0, %v2212_v16  ;;  %v1028_v23 = vpop.f32.mrf.mxu1  ;;  %v1276_v24 = vor.u32 1.1754944e-38, %v1275_v4  ;;  %v737_v25 = vmul.f32 %v2787_v51, %v736_v13 }
 0x155   :  { %v1029_v27 = vadd.f32 %v2621_v14, %v1028_v23  ;;  %v1272_v29 = vsel %vm1271_vm14, %v2772_v41, %v1268_v17  ;;  %vm2843_vm15 = vcmp.eq.f32.partialorder %v743_v15, 8.507059e+37  ;;  %v304_v31 = vsub.f32 0.0, %v265_v19 }
 0x156   :  { %v1277_v11 = vsel %vm2813_vm11, %v1276_v24, %v1272_v29  ;;  %v738_v32 = vadd.f32 %v2787_v51, %v737_v25  ;;  %v746_v33 = vor.u32 1.1754944e-38, %v745_v18  ;;  %v1280_v5 = vmul.f32 %v2822_v10, %v2774_v42 }
 0x157   :  { %v2216_v34 = vpop.eup %2215  ;;  %2221 = vrcp.f32 %v2834_v22  ;;  %v1112_v35 = vsub.f32 0.0, %v1029_v27  ;;  %2038 = vmatmul.msk.f32.gmra.mxu2 %vm896_vm4, %v1277_v11  ;;  %v364_v37 = vmul.f32 1.442695, %v304_v31  ;;  %vm1284_vm1 = vweird.f32 %v2774_v42 }
 0x158   :  { %v2859_v38 = vadd.f32 1.0, %v2216_v34  ;;  %v742_v39 = vsel %vm741_vm0, %v2787_v51, %v738_v32  ;;  %v1281_v40 = vsub.f32 1.0, %v1280_v5  ;;  %v1288_v41 = vand.u32 2147483647, %v2774_v42 }
 0x159   :  { %v2218_v43 = vpop.eup %2217  ;;  %v1150_v44 = vmul.f32 1.442695, %v1112_v35  ;;  %v747_v46 = vsel %vm2843_vm15, %v746_v33, %v742_v39  ;;  %2223 = vpow2.f32 %v364_v37  ;;  %v1290_v26 = vand.u32 2147483648, %v2774_v42 }
 0x15a   :  { %v2866_v48 = vpop.eup %2219  ;;  %v2868_v49 = vadd.f32 1.0, %v2218_v43  ;;  %2225 = vrcp.f32 %v2859_v38  ;;  %2026 = vmatmul.msk.f32.gmra.mxu1 %vm896_vm4, %v747_v46  ;;  %v1282_v50 = vmul.f32 %v2822_v10, %v1281_v40  ;;  %vm1285_vm2 = vweird.f32 %v2822_v10 }
 0x15b   :  { %2227 = vpow2.f32 %v1150_v44  ;;  %vm2874_vm3 = vcmp.eq.f32.partialorder %v1288_v41, 8.507059e+37  ;;  %v1291_v52 = vor.u32 1.1754944e-38, %v1290_v26  ;;  %v750_v53 = vmul.f32 %v2831_v20, %v2790_v36  ;;  %vm1286_vm6 = vmor %vm1284_vm1, %vm1285_vm2  ;;  %v270_v31 = vpop.f32.mrf.mxu3 }
 0x15c   :  { %2229 = vrcp.f32 %v2868_v49  ;;  %v1031_v47 = vpop.f32.mrf.mxu1  ;;  %v1283_v54 = vadd.f32 %v2822_v10, %v1282_v50  ;;  %vm754_vm5 = vweird.f32 %v2790_v36  ;;  %v758_v55 = vand.u32 2147483647, %v2790_v36 }
 0x15d   :  { %v2884_v56 = vpop.eup %2221  ;;  %v1032_v60 = vadd.f32 %v2621_v14, %v1031_v47  ;;  %v751_v61 = vsub.f32 1.0, %v750_v53  ;;  %v760_v62 = vand.u32 2147483648, %v2790_v36  ;;  %v268_v63 = vadd.f32 %v2653_v57, %v267_v3 }
 0x15e   :  { %v1287_v45 = vsel %vm1286_vm6, %v2822_v10, %v1283_v54  ;;  %vm755_vm7 = vweird.f32 %v2831_v20  ;;  %vm2893_vm8 = vcmp.eq.f32.partialorder %v758_v55, 8.507059e+37  ;;  %v1295_v1 = vmul.f32 %v2866_v48, %v2824_v12 }
 0x15f   :  { %v2224_v2 = vpop.eup %2223  ;;  %v1113_v4 = vsub.f32 0.0, %v1032_v60  ;;  %v1292_v42 = vsel %vm2874_vm3, %v1291_v52, %v1287_v45  ;;  %v752_v6 = vmul.f32 %v2831_v20, %v751_v61  ;;  %v761_v7 = vor.u32 1.1754944e-38, %v760_v62  ;;  %vm756_vm10 = vmor %vm754_vm5, %vm755_vm7 }
 0x160   :  { %v2902_v8 = vpop.eup %2225  ;;  %v2904_v9 = vadd.f32 1.0, %v2224_v2  ;;  %2039 = vmatmul.msk.f32.gmra.mxu2 %vm896_vm4, %v1292_v42  ;;  %v305_v10 = vsub.f32 0.0, %v268_v63  ;;  %v1296_v13 = vsub.f32 1.0, %v1295_v1  ;;  %vm1300_vm9 = vweird.f32 %v2866_v48 }
 0x161   :  { %v2228_v15 = vpop.eup %2227  ;;  %v1152_v16 = vmul.f32 1.442695, %v1113_v4  ;;  %v753_v17 = vadd.f32 %v2831_v20, %v752_v6  ;;  %v1303_v18 = vand.u32 2147483647, %v2824_v12  ;;  %v1305_v19 = vand.u32 2147483648, %v2824_v12 }
 0x162   :  { %v2911_v23 = vpop.eup %2229  ;;  %v2913_v24 = vadd.f32 1.0, %v2228_v15  ;;  %2231 = vrcp.f32 %v2904_v9  ;;  %v366_v25 = vmul.f32 1.442695, %v305_v10  ;;  %v1297_v27 = vmul.f32 %v2866_v48, %v1296_v13 }
 0x163   :  { %2233 = vpow2.f32 %v1152_v16  ;;  %v757_v29 = vsel %vm756_vm10, %v2831_v20, %v753_v17  ;;  %vm1299_vm11 = vweird.f32 %v2824_v12  ;;  %vm2923_vm12 = vcmp.eq.f32.partialorder %v1303_v18, 8.507059e+37  ;;  %v273_v6 = vpop.f32.mrf.mxu3 }
 0x164   :  { %2235 = vrcp.f32 %v2913_v24  ;;  %v762_v11 = vsel %vm2893_vm8, %v761_v7, %v757_v29  ;;  %v1034_v36 = vpop.f32.mrf.mxu1  ;;  %v1298_v32 = vadd.f32 %v2866_v48, %v1297_v27  ;;  %v765_v33 = vmul.f32 %v2884_v56, %v2834_v22  ;;  %vm1301_vm13 = vmor %vm1299_vm11, %vm1300_vm9 }
 0x165   :  { %2027 = vmatmul.msk.f32.gmra.mxu1 %vm896_vm4, %v762_v11  ;;  %2237 = vpow2.f32 %v366_v25  ;;  %v1035_v12 = vadd.f32 %v2621_v14, %v1034_v36  ;;  %v1306_v20 = vor.u32 1.1754944e-38, %v1305_v19  ;;  %vm769_vm14 = vweird.f32 %v2834_v22 }
 0x166   :  { %v1302_v5 = vsel %vm1301_vm13, %v2866_v48, %v1298_v32  ;;  %v766_v34 = vsub.f32 1.0, %v765_v33  ;;  %v773_v35 = vand.u32 2147483647, %v2834_v22  ;;  %v775_v37 = vand.u32 2147483648, %v2834_v22 }
 0x167   :  { %v1114_v39 = vsub.f32 0.0, %v1035_v12  ;;  %v1307_v40 = vsel %vm2923_vm12, %v1306_v20, %v1302_v5  ;;  %v271_v41 = vadd.f32 %v2653_v57, %v270_v31  ;;  %v1310_v43 = vmul.f32 %v2911_v23, %v2868_v49 }
 0x168   :  { %v2946_v44 = vpop.eup %2231  ;;  %2040 = vmatmul.msk.f32.gmra.mxu2 %vm896_vm4, %v1307_v40  ;;  %v767_v46 = vmul.f32 %v2884_v56, %v766_v34  ;;  %vm770_vm15 = vweird.f32 %v2884_v56  ;;  %vm2951_vm0 = vcmp.eq.f32.partialorder %v773_v35, 8.507059e+37  ;;  %v776_v3 = vor.u32 1.1754944e-38, %v775_v37 }
 0x169   :  { %v2234_v48 = vpop.eup %2233  ;;  %v1154_v50 = vmul.f32 1.442695, %v1114_v39  ;;  %v306_v51 = vsub.f32 0.0, %v271_v41  ;;  %v1311_v52 = vsub.f32 1.0, %v1310_v43  ;;  %vm1315_vm1 = vweird.f32 %v2911_v23  ;;  %vm771_vm2 = vmor %vm769_vm14, %vm770_vm15 }
 0x16a   :  { %v2956_v53 = vpop.eup %2235  ;;  %v2958_v47 = vadd.f32 1.0, %v2234_v48  ;;  %v768_v54 = vadd.f32 %v2884_v56, %v767_v46  ;;  %v1318_v55 = vand.u32 2147483647, %v2868_v49  ;;  %v1320_v60 = vand.u32 2147483648, %v2868_v49 }
 0x16b   :  { %v2238_v61 = vpop.eup %2237  ;;  %2239 = vpow2.f32 %v1154_v50  ;;  %v368_v62 = vmul.f32 1.442695, %v306_v51  ;;  %v1312_v63 = vmul.f32 %v2911_v23, %v1311_v52  ;;  %v780_v45 = vmul.f32 %v2716_v58, %v2677_v21 }
 0x16c   :  { %2241 = vrcp.f32 %v2958_v47  ;;  %v2971_v0 = vadd.f32 1.0, %v2238_v61  ;;  %v772_v1 = vsel %vm771_vm2, %v2884_v56, %v768_v54  ;;  %v1037_v2 = vpop.f32.mrf.mxu1  ;;  %vm1314_vm3 = vweird.f32 %v2868_v49 }
 0x16d   :  { %v777_v4 = vsel %vm2951_vm0, %v776_v3, %v772_v1  ;;  %2243 = vpow2.f32 %v368_v62  ;;  %v1038_v22 = vadd.f32 %v2621_v14, %v1037_v2  ;;  %v1313_v42 = vadd.f32 %v2911_v23, %v1312_v63  ;;  %vm1316_vm5 = vmor %vm1314_vm3, %vm1315_vm1 }
 0x16e   :  { %2028 = vmatmul.msk.f32.vlgmr.msrb.gmra.mxu3 %vm896_vm4, %v777_v4  ;;  %vm1319_vm6 = vcmp.eq.f32.partialorder %v1318_v55, 8.507059e+37  ;;  %v1321_v7 = vor.u32 1.1754944e-38, %v1320_v60  ;;  %v781_v56 = vsub.f32 1.0, %v780_v45  ;;  %vm784_vm7 = vweird.f32 %v2677_v21 }
 0x16f   :  { %v1115_v49 = vsub.f32 0.0, %v1038_v22  ;;  %v1317_v10 = vsel %vm1316_vm5, %v2911_v23, %v1313_v42  ;;  %vm785_vm8 = vweird.f32 %v2716_v58  ;;  %v788_v13 = vand.u32 2147483647, %v2677_v21 }
 0x170   :  { %v1322_v15 = vsel %vm1319_vm6, %v1321_v7, %v1317_v10  ;;  %v782_v16 = vmul.f32 %v2716_v58, %v781_v56  ;;  %v790_v17 = vand.u32 2147483648, %v2677_v21  ;;  %v274_v18 = vadd.f32 %v2653_v57, %v273_v6  ;;  %vm2991_vm9 = vmor %vm784_vm7, %vm785_vm8 }
 0x171   :  { %v2240_v19 = vpop.eup %2239  ;;  %2245 = vrcp.f32 %v2971_v0  ;;  %v1156_v25 = vmul.f32 1.442695, %v1115_v49  ;;  %2041 = vmatmul.msk.f32.gmra.mxu2 %vm896_vm4, %v1322_v15  ;;  %vm2995_vm10 = vcmp.eq.f32.partialorder %v788_v13, 8.507059e+37  ;;  %v1325_v29 = vmul.f32 %v2956_v53, %v2913_v24 }
 0x172   :  { %v3001_v21 = vpop.eup %2241  ;;  %v3003_v57 = vadd.f32 1.0, %v2240_v19  ;;  %v783_v30 = vadd.f32 %v2716_v58, %v782_v16  ;;  %v791_v31 = vor.u32 1.1754944e-38, %v790_v17  ;;  %v307_v11 = vsub.f32 0.0, %v274_v18 }
 0x173   :  { %v2244_v36 = vpop.eup %2243  ;;  %2247 = vpow2.f32 %v1156_v25  ;;  %v1326_v32 = vsub.f32 1.0, %v1325_v29  ;;  %vm1329_vm11 = vweird.f32 %v2913_v24  ;;  %vm1330_vm12 = vweird.f32 %v2956_v53 }
 0x174   :  { %v787_v33 = vsel %vm2991_vm9, %v2716_v58, %v783_v30  ;;  %v370_v12 = vmul.f32 1.442695, %v307_v11  ;;  %v1040_v20 = vpop.f32.mrf.mxu1  ;;  %v1333_v5 = vand.u32 2147483647, %v2913_v24  ;;  %2249 = vrcp.f32 %v3003_v57  ;;  %vm1331_vm15 = vmor %vm1329_vm11, %vm1330_vm12 }
 0x175   :  { %v792_v34 = vsel %vm2995_vm10, %v791_v31, %v787_v33  ;;  %v1041_v35 = vadd.f32 %v2621_v14, %v1040_v20  ;;  %v1327_v37 = vmul.f32 %v2956_v53, %v1326_v32  ;;  %v3017_v39 = vadd.f32 1.0, %v2244_v36 }
 0x176   :  { %2029 = vmatmul.msk.f32.gmra.mxu3 %vm896_vm4, %v792_v34  ;;  %v1335_v58 = vand.u32 2147483648, %v2913_v24  ;;  %v795_v40 = vmul.f32 %v2803_v59, %v2759_v28  ;;  %vm799_vm13 = vweird.f32 %v2759_v28  ;;  %2251 = vpow2.f32 %v370_v12 }
 0x177   :  { %v3024_v41 = vpop.eup %2245  ;;  %v1116_v43 = vsub.f32 0.0, %v1041_v35  ;;  %v1328_v46 = vadd.f32 %v2956_v53, %v1327_v37  ;;  %vm800_vm14 = vweird.f32 %v2803_v59  ;;  %v803_v48 = vand.u32 2147483647, %v2759_v28 }
 0x178   :  { %v1336_v26 = vor.u32 1.1754944e-38, %v1335_v58  ;;  %v796_v3 = vsub.f32 1.0, %v795_v40  ;;  %v805_v50 = vand.u32 2147483648, %v2759_v28  ;;  %vm1334_vm0 = vcmp.eq.f32.partialorder %v1333_v5, 8.507059e+37  ;;  %vm3048_vm2 = vmor %vm799_vm13, %vm800_vm14 }
 0x179   :  { %v2248_v51 = vpop.eup %2247  ;;  %v1158_v52 = vmul.f32 1.442695, %v1116_v43  ;;  %v1332_v54 = vsel %vm1331_vm15, %v2956_v53, %v1328_v46  ;;  %v1340_v55 = vmul.f32 %v3001_v21, %v2958_v47  ;;  %vm1344_vm1 = vweird.f32 %v2958_v47 }
 0x17a   :  { %v3037_v60 = vadd.f32 1.0, %v2248_v51  ;;  %v1337_v61 = vsel %vm1334_vm0, %v1336_v26, %v1332_v54  ;;  %v797_v24 = vmul.f32 %v2803_v59, %v796_v3  ;;  %v3041_v62 = vpop.eup %2249  ;;  %vm3052_vm3 = vcmp.eq.f32.partialorder %v803_v48, 8.507059e+37 }
 0x17b   :  { %2253 = vpow2.f32 %v1158_v52  ;;  %2042 = vmatmul.msk.f32.gmra.mxu2 %vm896_vm4, %v1337_v61  ;;  %v806_v45 = vor.u32 1.1754944e-38, %v805_v50  ;;  %v1341_v1 = vsub.f32 1.0, %v1340_v55  ;;  %vm1345_vm5 = vweird.f32 %v3001_v21 }
 0x17c   :  { %v798_v2 = vadd.f32 %v2803_v59, %v797_v24  ;;  %v1043_v4 = vpop.f32.mrf.mxu1  ;;  %v1348_v22 = vand.u32 2147483647, %v2958_v47  ;;  %v1350_v42 = vand.u32 2147483648, %v2958_v47  ;;  %v2252_v28 = vpop.eup %2251  ;;  %2255 = vrcp.f32 %v3037_v60  ;;  %vm1346_vm8 = vmor %vm1344_vm1, %vm1345_vm5 }
 0x17d   :  { %v1044_v6 = vadd.f32 %v2621_v14, %v1043_v4  ;;  %v1342_v7 = vmul.f32 %v3001_v21, %v1341_v1  ;;  %v810_v56 = vmul.f32 %v2902_v8, %v2859_v38  ;;  %v3065_v49 = vadd.f32 1.0, %v2252_v28  ;;  %v3161_v28 = vld [vmem:[%s3514_s4] ss:$0 sm:$0xff] }
 0x17e   :  { %v802_v10 = vsel %vm3048_vm2, %v2803_v59, %v798_v2  ;;  %vm3070_vm6 = vcmp.eq.f32.partialorder %v1348_v22, 8.507059e+37  ;;  %vm814_vm7 = vweird.f32 %v2859_v38  ;;  %v1351_v59 = vor.u32 1.1754944e-38, %v1350_v42 }
 0x17f   :  { %v807_v15 = vsel %vm3052_vm3, %v806_v45, %v802_v10  ;;  %v1117_v16 = vsub.f32 0.0, %v1044_v6  ;;  %v1343_v17 = vadd.f32 %v3001_v21, %v1342_v7  ;;  %v811_v18 = vsub.f32 1.0, %v810_v56 }
 0x180   :  { %2030 = vmatmul.msk.f32.gmra.mxu3 %vm896_vm4, %v807_v15  ;;  %vm815_vm9 = vweird.f32 %v2902_v8  ;;  %v818_v19 = vand.u32 2147483647, %v2859_v38  ;;  %v820_v25 = vand.u32 2147483648, %v2859_v38  ;;  %v1355_v31 = vmul.f32 %v3041_v62, %v3003_v57 }
 0x181   :  { %v2254_v27 = vpop.eup %2253  ;;  %v1160_v23 = vmul.f32 1.442695, %v1117_v16  ;;  %v1347_v29 = vsel %vm1346_vm8, %v3001_v21, %v1343_v17  ;;  %v812_v30 = vmul.f32 %v2902_v8, %v811_v18  ;;  %2257 = vrcp.f32 %v3017_v39  ;;  %vm3097_vm10 = vmor %vm814_vm7, %vm815_vm9 }
 0x182   :  { %v3091_v47 = vadd.f32 1.0, %v2254_v27  ;;  %v1352_v11 = vsel %vm3070_vm6, %v1351_v59, %v1347_v29  ;;  %v821_v32 = vor.u32 1.1754944e-38, %v820_v25  ;;  %v3101_v21 = vpop.eup %2255  ;;  %vm819_vm11 = vcmp.eq.f32.partialorder %v818_v19, 8.507059e+37 }
 0x183   :  { %2259 = vpow2.f32 %v1160_v23  ;;  %2043 = vmatmul.msk.f32.gmra.mxu2 %vm896_vm4, %v1352_v11  ;;  %v813_v33 = vadd.f32 %v2902_v8, %v812_v30  ;;  %v1356_v12 = vsub.f32 1.0, %v1355_v31  ;;  %vm1360_vm12 = vweird.f32 %v3041_v62 }
 0x184   :  { %2261 = vrcp.f32 %v3065_v49  ;;  %v1046_v20 = vpop.f32.mrf.mxu1  ;;  %v1363_v38 = vand.u32 2147483647, %v3003_v57  ;;  %v1365_v5 = vand.u32 2147483648, %v3003_v57  ;;  %v825_v58 = vmul.f32 %v2946_v44, %v2904_v9 }
 0x185   :  { %v817_v34 = vsel %vm3097_vm10, %v2902_v8, %v813_v33  ;;  %v1047_v35 = vadd.f32 %v2621_v14, %v1046_v20  ;;  %v1357_v37 = vmul.f32 %v3041_v62, %v1356_v12  ;;  %2263 = vrcp.f32 %v3091_v47 }
 0x186   :  { %v822_v40 = vsel %vm819_vm11, %v821_v32, %v817_v34  ;;  %vm1359_vm13 = vweird.f32 %v3003_v57  ;;  %vm829_vm14 = vweird.f32 %v2904_v9  ;;  %v826_v26 = vsub.f32 1.0, %v825_v58 }
 0x187   :  { %v1118_v43 = vsub.f32 0.0, %v1047_v35  ;;  %v1358_v46 = vadd.f32 %v3041_v62, %v1357_v37  ;;  %vm830_vm15 = vweird.f32 %v2946_v44  ;;  %v3121_v8 = vpop.eup %2257  ;;  %vm1361_vm0 = vmor %vm1359_vm13, %vm1360_vm12  ;;  %v1366_v14 = vor.u32 1.1754944e-38, %v1365_v5 }
 0x188   :  { %2031 = vmatmul.msk.f32.gmra.mxu3 %vm896_vm4, %v822_v40  ;;  %v833_v3 = vand.u32 2147483647, %v2904_v9  ;;  %v835_v57 = vand.u32 2147483648, %v2904_v9  ;;  %v1370_v48 = vmul.f32 %v3101_v21, %v3037_v60  ;;  %vm1364_vm1 = vcmp.eq.f32.partialorder %v1363_v38, 8.507059e+37  ;;  %vm3140_vm2 = vmor %vm829_vm14, %vm830_vm15 }
 0x189   :  { %v2260_v50 = vpop.eup %2259  ;;  %v1162_v51 = vmul.f32 1.442695, %v1118_v43  ;;  %v1362_v52 = vsel %vm1361_vm0, %v3041_v62, %v1358_v46  ;;  %v827_v54 = vmul.f32 %v2946_v44, %v826_v26  ;;  %vm1374_vm3 = vweird.f32 %v3037_v60 }
 0x18a   :  { %v3132_v55 = vpop.eup %2261  ;;  %v3134_v61 = vadd.f32 1.0, %v2260_v50  ;;  %v1367_v24 = vsel %vm1364_vm1, %v1366_v14, %v1362_v52  ;;  %v836_v63 = vor.u32 1.1754944e-38, %v835_v57  ;;  %vm834_vm5 = vcmp.eq.f32.partialorder %v833_v3, 8.507059e+37 }
 0x18b   :  { %2265 = vpow2.f32 %v1162_v51  ;;  %2044 = vmatmul.msk.f32.gmra.mxu2 %vm896_vm4, %v1367_v24  ;;  %v828_v62 = vadd.f32 %v2946_v44, %v827_v54  ;;  %v1371_v45 = vsub.f32 1.0, %v1370_v48  ;;  %v3147_v1 = vpop.eup %2263  ;;  %vm1375_vm6 = vweird.f32 %v3101_v21 }
 0x18c   :  { %v1049_v2 = vpop.f32.mrf.mxu1  ;;  %v1378_v9 = vand.u32 2147483647, %v3037_v60  ;;  %v1380_v4 = vand.u32 2147483648, %v3037_v60  ;;  %v840_v22 = vmul.f32 %v3024_v41, %v2971_v0  ;;  %2267 = vrcp.f32 %v3134_v61  ;;  %vm1376_vm9 = vmor %vm1374_vm3, %vm1375_vm6 }
 0x18d   :  { %v832_v42 = vsel %vm3140_vm2, %v2946_v44, %v828_v62  ;;  %v1050_v6 = vadd.f32 %v3161_v28, %v1049_v2  ;;  %v1372_v7 = vmul.f32 %v3101_v21, %v1371_v45  ;;  %vm844_vm7 = vweird.f32 %v2971_v0 }
 0x18e   :  { %v837_v56 = vsel %vm834_vm5, %v836_v63, %v832_v42  ;;  %v841_v10 = vsub.f32 1.0, %v840_v22  ;;  %vm845_vm8 = vweird.f32 %v3024_v41  ;;  %v848_v44 = vand.u32 2147483647, %v2971_v0 }
 0x18f   :  { %v1119_v13 = vsub.f32 0.0, %v1050_v6  ;;  %v1373_v15 = vadd.f32 %v3101_v21, %v1372_v7  ;;  %v850_v16 = vand.u32 2147483648, %v2971_v0  ;;  %vm1379_vm10 = vcmp.eq.f32.partialorder %v1378_v9, 8.507059e+37  ;;  %vm3181_vm11 = vmor %vm844_vm7, %vm845_vm8 }
 0x190   :  { %2032 = vmatmul.msk.f32.gmra.mxu3 %vm896_vm4, %v837_v56  ;;  %v1381_v17 = vor.u32 1.1754944e-38, %v1380_v4  ;;  %v842_v18 = vmul.f32 %v3024_v41, %v841_v10  ;;  %v1385_v59 = vmul.f32 %v3147_v1, %v3091_v47  ;;  %vm3185_vm12 = vcmp.eq.f32.partialorder %v848_v44, 8.507059e+37 }
 0x191   :  { %v2266_v19 = vpop.eup %2265  ;;  %v1164_v25 = vmul.f32 1.442695, %v1119_v13  ;;  %v1377_v27 = vsel %vm1376_vm9, %v3101_v21, %v1373_v15  ;;  %v851_v29 = vor.u32 1.1754944e-38, %v850_v16  ;;  %vm1389_vm13 = vweird.f32 %v3091_v47 }
 0x192   :  { %v3189_v30 = vadd.f32 1.0, %v2266_v19  ;;  %v1382_v31 = vsel %vm1379_vm10, %v1381_v17, %v1377_v27  ;;  %v843_v11 = vadd.f32 %v3024_v41, %v842_v18  ;;  %v1386_v36 = vsub.f32 1.0, %v1385_v59  ;;  %v3192_v32 = vpop.eup %2267 }
 0x193   :  { %2269 = vpow2.f32 %v1164_v25  ;;  %2045 = vmatmul.msk.f32.gmra.mxu2 %vm896_vm4, %v1382_v31  ;;  %v1395_v0 = vand.u32 2147483648, %v3091_v47  ;;  %v855_v21 = vmul.f32 %v3121_v8, %v3017_v39  ;;  %vm1390_vm14 = vweird.f32 %v3147_v1 }
 0x194   :  { %v847_v33 = vsel %vm3181_vm11, %v3024_v41, %v843_v11  ;;  %v1052_v12 = vpop.f32.mrf.mxu1  ;;  %v1387_v20 = vmul.f32 %v3147_v1, %v1386_v36  ;;  %v1393_v38 = vand.u32 2147483647, %v3091_v47  ;;  %2271 = vrcp.f32 %v3189_v30  ;;  %vm1391_vm1 = vmor %vm1389_vm13, %vm1390_vm14 }
 0x195   :  { %v852_v5 = vsel %vm3185_vm12, %v851_v29, %v847_v33  ;;  %v1053_v34 = vadd.f32 %v3161_v28, %v1052_v12  ;;  %vm859_vm15 = vweird.f32 %v3017_v39  ;;  %v856_v37 = vsub.f32 1.0, %v855_v21 }
 0x196   :  { %v1388_v35 = vadd.f32 %v3147_v1, %v1387_v20  ;;  %vm860_vm0 = vweird.f32 %v3121_v8  ;;  %v863_v41 = vand.u32 2147483647, %v3017_v39  ;;  %v1396_v40 = vor.u32 1.1754944e-38, %v1395_v0 }
 0x197   :  { %v1120_v58 = vsub.f32 0.0, %v1053_v34  ;;  %v865_v43 = vand.u32 2147483648, %v3017_v39  ;;  %v1400_v46 = vmul.f32 %v3192_v32, %v3134_v61  ;;  %vm1394_vm2 = vcmp.eq.f32.partialorder %v1393_v38, 8.507059e+37  ;;  %vm3229_vm5 = vmor %vm859_vm15, %vm860_vm0 }
 0x198   :  { %2033 = vmatmul.msk.f32.gmra.mxu3 %vm896_vm4, %v852_v5  ;;  %v1392_v26 = vsel %vm1391_vm1, %v3147_v1, %v1388_v35  ;;  %v857_v14 = vmul.f32 %v3121_v8, %v856_v37  ;;  %vm3221_vm3 = vcmp.eq.f32.partialorder %v863_v41, 8.507059e+37  ;;  %v1408_v53 = vand.u32 2147483647, %v3134_v61 }
 0x199   :  { %v2270_v57 = vpop.eup %2269  ;;  %v1166_v47 = vmul.f32 1.442695, %v1120_v58  ;;  %v1397_v48 = vsel %vm1394_vm2, %v1396_v40, %v1392_v26  ;;  %v866_v51 = vor.u32 1.1754944e-38, %v865_v43  ;;  %v1401_v52 = vsub.f32 1.0, %v1400_v46 }
 0x19a   :  { %v3233_v54 = vadd.f32 1.0, %v2270_v57  ;;  %v858_v24 = vadd.f32 %v3121_v8, %v857_v14  ;;  %v1410_v63 = vand.u32 2147483648, %v3134_v61  ;;  %v2272_v62 = vpop.eup %2271  ;;  %vm1405_vm6 = vweird.f32 %v3192_v32 }
 0x19b   :  { %2273 = vpow2.f32 %v1166_v47  ;;  %2046 = vmatmul.msk.f32.gmra.mxu2 %vm896_vm4, %v1397_v48  ;;  %v1402_v39 = vmul.f32 %v3192_v32, %v1401_v52  ;;  %v870_v45 = vmul.f32 %v3132_v55, %v3065_v49  ;;  %vm1404_vm7 = vweird.f32 %v3134_v61 }
 0x19c   :  { %2275 = vrcp.f32 %v3233_v54  ;;  %v862_v1 = vsel %vm3229_vm5, %v3121_v8, %v858_v24  ;;  %v1055_v2 = vpop.f32.mrf.mxu1  ;;  %vm874_vm8 = vweird.f32 %v3065_v49  ;;  %vm1409_vm9 = vcmp.eq.f32.partialorder %v1408_v53, 8.507059e+37  ;;  %vm1406_vm10 = vmor %vm1404_vm7, %vm1405_vm6 }
 0x19d   :  { %v1056_v9 = vadd.f32 %v3161_v28, %v1055_v2  ;;  %v1403_v4 = vadd.f32 %v3192_v32, %v1402_v39  ;;  %v871_v22 = vsub.f32 1.0, %v870_v45  ;;  %v867_v42 = vsel %vm3221_vm3, %v866_v51, %v862_v1 }
 0x19e   :  { %v1411_v6 = vor.u32 1.1754944e-38, %v1410_v63  ;;  %vm875_vm11 = vweird.f32 %v3132_v55  ;;  %v1415_v8 = vmul.f32 %v2272_v62, %v3189_v30  ;;  %v880_v10 = vand.u32 2147483648, %v3065_v49 }
 0x19f   :  { %v1121_v7 = vsub.f32 0.0, %v1056_v9  ;;  %v1407_v61 = vsel %vm1406_vm10, %v3192_v32, %v1403_v4  ;;  %v872_v56 = vmul.f32 %v3132_v55, %v871_v22  ;;  %v878_v15 = vand.u32 2147483647, %v3065_v49  ;;  %vm3263_vm12 = vmor %vm874_vm8, %vm875_vm11 }
 0x1a0   :  { %2034 = vmatmul.msk.f32.gmra.mxu3 %vm896_vm4, %v867_v42  ;;  %v1412_v13 = vsel %vm1409_vm9, %v1411_v6, %v1407_v61  ;;  %v1416_v44 = vsub.f32 1.0, %v1415_v8  ;;  %vm1419_vm13 = vweird.f32 %v3189_v30  ;;  %vm1420_vm14 = vweird.f32 %v2272_v62 }
 0x1a1   :  { %v2274_v16 = vpop.eup %2273  ;;  %v1168_v17 = vmul.f32 1.442695, %v1121_v7  ;;  %v873_v18 = vadd.f32 %v3132_v55, %v872_v56  ;;  %v1425_v23 = vand.u32 2147483648, %v3189_v30  ;;  %v881_v60 = vor.u32 1.1754944e-38, %v880_v10  ;;  %vm1421_vm0 = vmor %vm1419_vm13, %vm1420_vm14 }
 0x1a2   :  { %v2276_v19 = vpop.eup %2275  ;;  %v3268_v25 = vadd.f32 1.0, %v2274_v16  ;;  %v1417_v27 = vmul.f32 %v2272_v62, %v1416_v44  ;;  %v1423_v29 = vand.u32 2147483647, %v3189_v30  ;;  %vm879_vm15 = vcmp.eq.f32.partialorder %v878_v15, 8.507059e+37 }
 0x1a3   :  { %2277 = vpow2.f32 %v1168_v17  ;;  %2047 = vmatmul.msk.f32.gmra.mxu2 %vm896_vm4, %v1412_v13  ;;  %v1430_v49 = vmul.f32 %v2276_v19, %v3233_v54  ;;  %v877_v31 = vsel %vm3263_vm12, %v3132_v55, %v873_v18  ;;  %v1426_v33 = vor.u32 1.1754944e-38, %v1425_v23 }
 0x1a4   :  { %2279 = vrcp.f32 %v3268_v25  ;;  %v1058_v11 = vpop.f32.mrf.mxu1  ;;  %v1418_v36 = vadd.f32 %v2272_v62, %v1417_v27  ;;  %v882_v12 = vsel %vm879_vm15, %v881_v60, %v877_v31  ;;  %vm1424_vm1 = vcmp.eq.f32.partialorder %v1423_v29, 8.507059e+37 }
 0x1a5   :  { %v1059_v32 = vadd.f32 %v3161_v28, %v1058_v11  ;;  %v1431_v0 = vsub.f32 1.0, %v1430_v49  ;;  %vm1435_vm2 = vweird.f32 %v2276_v19  ;;  %v1440_v58 = vand.u32 2147483648, %v3233_v54 }
 0x1a6   :  { %v1422_v21 = vsel %vm1421_vm0, %v2272_v62, %v1418_v36  ;;  %vm1434_vm3 = vweird.f32 %v3233_v54  ;;  %v1438_v30 = vand.u32 2147483647, %v3233_v54  ;;  %v1455_v53 = vand.u32 2147483648, %v3268_v25 }
 0x1a7   :  { %v1122_v20 = vsub.f32 0.0, %v1059_v32  ;;  %v1432_v38 = vmul.f32 %v2276_v19, %v1431_v0  ;;  %v1427_v5 = vsel %vm1424_vm1, %v1426_v33, %v1422_v21  ;;  %vm1436_vm5 = vmor %vm1434_vm3, %vm1435_vm2  ;;  %v1441_v3 = vor.u32 1.1754944e-38, %v1440_v58  ;;  %v3306_v33 = vld [vmem:[%s3516_s6] ss:$0 sm:$0xff] }
 0x1a8   :  { %2035 = vmatmul.msk.f32.gmra.mxu3 %vm896_vm4, %v882_v12  ;;  %vm1439_vm6 = vcmp.eq.f32.partialorder %v1438_v30, 8.507059e+37  ;;  %vm1449_vm8 = vweird.f32 %v3268_v25  ;;  %v1453_v63 = vand.u32 2147483647, %v3268_v25  ;;  %v1456_v9 = vor.u32 1.1754944e-38, %v1455_v53 }
 0x1a9   :  { %v2278_v34 = vpop.eup %2277  ;;  %v1170_v55 = vmul.f32 1.442695, %v1122_v20  ;;  %v1433_v35 = vadd.f32 %v2276_v19, %v1432_v38  ;;  %vm1935_vm3 = vcmask 130048  }
 0x1aa   :  { %v2280_v37 = vpop.eup %2279  ;;  %v1217_v41 = vadd.f32 1.0, %v2278_v34  ;;  %vm1454_vm10 = vcmp.eq.f32.partialorder %v1453_v63, 8.507059e+37 }
 0x1ab   :  { %2281 = vpow2.f32 %v1170_v55  ;;  %2048 = vmatmul.msk.f32.gmra.mxu2 %vm896_vm4, %v1427_v5  ;;  %v1445_v40 = vmul.f32 %v2280_v37, %v3268_v25  ;;  %v1437_v26 = vsel %vm1436_vm5, %v2276_v19, %v1433_v35  ;;  %vm1450_vm7 = vweird.f32 %v2280_v37 }
 0x1ac   :  { %2283 = vrcp.f32 %v1217_v41  ;;  %v1061_v43 = vpop.f32.mrf.mxu1  ;;  %v1442_v48 = vsel %vm1439_vm6, %v1441_v3, %v1437_v26  ;;  %vm1451_vm9 = vmor %vm1449_vm8, %vm1450_vm7  ;;  %v1470_v10 = vand.u32 2147483648, %v1217_v41  ;;  %vm1464_vm12 = vweird.f32 %v1217_v41 }
 0x1ad   :  { %v1062_v46 = vadd.f32 %v3161_v28, %v1061_v43  ;;  %v1446_v14 = vsub.f32 1.0, %v1445_v40  ;;  %v1468_v13 = vand.u32 2147483647, %v1217_v41 }
 0x1ae   :  { %v1471_v59 = vor.u32 1.1754944e-38, %v1470_v10 }
 0x1af   :  { %v1123_v57 = vsub.f32 0.0, %v1062_v46  ;;  %v1447_v47 = vmul.f32 %v2280_v37, %v1446_v14  ;;  %vm1469_vm14 = vcmp.eq.f32.partialorder %v1468_v13, 8.507059e+37 }
 0x1b1   :  { %v2282_v50 = vpop.eup %2281  ;;  %v1172_v51 = vmul.f32 1.442695, %v1123_v57  ;;  %v1448_v52 = vadd.f32 %v2280_v37, %v1447_v47 }
 0x1b2   :  { %v2284_v24 = vpop.eup %2283  ;;  %v1218_v54 = vadd.f32 1.0, %v2282_v50 }
 0x1b3   :  { %2285 = vpow2.f32 %v1172_v51  ;;  %2049 = vmatmul.msk.f32.gmra.mxu2 %vm896_vm4, %v1442_v48  ;;  %v1460_v62 = vmul.f32 %v2284_v24, %v1217_v41  ;;  %v1452_v1 = vsel %vm1451_vm9, %v2280_v37, %v1448_v52  ;;  %vm1465_vm11 = vweird.f32 %v2284_v24 }
 0x1b4   :  { %2287 = vrcp.f32 %v1218_v54  ;;  %v1064_v39 = vpop.f32.mrf.mxu1  ;;  %v1457_v42 = vsel %vm1454_vm10, %v1456_v9, %v1452_v1  ;;  %vm1466_vm13 = vmor %vm1464_vm12, %vm1465_vm11  ;;  %v1485_v11 = vand.u32 2147483648, %v1218_v54  ;;  %vm1479_vm0 = vweird.f32 %v1218_v54 }
 0x1b5   :  { %v1065_v45 = vadd.f32 %v3161_v28, %v1064_v39  ;;  %v1461_v2 = vsub.f32 1.0, %v1460_v62  ;;  %v1483_v36 = vand.u32 2147483647, %v1218_v54 }
 0x1b6   :  { %v1486_v38 = vor.u32 1.1754944e-38, %v1485_v11 }
 0x1b7   :  { %v1124_v4 = vsub.f32 0.0, %v1065_v45  ;;  %v1462_v22 = vmul.f32 %v2284_v24, %v1461_v2  ;;  %vm1484_vm2 = vcmp.eq.f32.partialorder %v1483_v36, 8.507059e+37 }
 0x1b9   :  { %v2286_v6 = vpop.eup %2285  ;;  %v1174_v8 = vmul.f32 1.442695, %v1124_v4  ;;  %v1463_v7 = vadd.f32 %v2284_v24, %v1462_v22 }
 0x1ba   :  { %v2288_v61 = vpop.eup %2287  ;;  %v3293_v56 = vadd.f32 1.0, %v2286_v6 }
 0x1bb   :  { %2289 = vpow2.f32 %v1174_v8  ;;  %2050 = vmatmul.msk.f32.gmra.mxu2 %vm896_vm4, %v1457_v42  ;;  %v1475_v15 = vmul.f32 %v2288_v61, %v1218_v54  ;;  %v1467_v17 = vsel %vm1466_vm13, %v2284_v24, %v1463_v7  ;;  %vm1480_vm15 = vweird.f32 %v2288_v61 }
 0x1bc   :  { %2291 = vrcp.f32 %v3293_v56  ;;  %v1067_v44 = vpop.f32.mrf.mxu1  ;;  %v1472_v27 = vsel %vm1469_vm14, %v1471_v59, %v1467_v17  ;;  %vm1481_vm1 = vmor %vm1479_vm0, %vm1480_vm15  ;;  %v1500_v46 = vand.u32 2147483648, %v3293_v56  ;;  %vm1494_vm6 = vweird.f32 %v3293_v56 }
 0x1bd   :  { %v1068_v16 = vadd.f32 %v3161_v28, %v1067_v44  ;;  %v1476_v18 = vsub.f32 1.0, %v1475_v15  ;;  %v1498_v26 = vand.u32 2147483647, %v3293_v56 }
 0x1be   :  { %v1501_v50 = vor.u32 1.1754944e-38, %v1500_v46 }
 0x1bf   :  { %v1125_v19 = vsub.f32 0.0, %v1068_v16  ;;  %v1477_v25 = vmul.f32 %v2288_v61, %v1476_v18  ;;  %vm1499_vm8 = vcmp.eq.f32.partialorder %v1498_v26, 8.507059e+37 }
 0x1c1   :  { %v2290_v23 = vpop.eup %2289  ;;  %v1176_v60 = vmul.f32 1.442695, %v1125_v19  ;;  %v1478_v29 = vadd.f32 %v2288_v61, %v1477_v25 }
 0x1c2   :  { %v2292_v49 = vpop.eup %2291  ;;  %v3298_v31 = vadd.f32 1.0, %v2290_v23 }
 0x1c3   :  { %2293 = vpow2.f32 %v1176_v60  ;;  %2051 = vmatmul.msk.f32.gmra.mxu2 %vm896_vm4, %v1472_v27  ;;  %v1490_v32 = vmul.f32 %v2292_v49, %v3293_v56  ;;  %v1482_v21 = vsel %vm1481_vm1, %v2288_v61, %v1478_v29  ;;  %vm1495_vm5 = vweird.f32 %v2292_v49 }
 0x1c4   :  { %2295 = vrcp.f32 %v3298_v31  ;;  %v1487_v55 = vsel %vm1484_vm2, %v1486_v38, %v1482_v21  ;;  %vm1496_vm7 = vmor %vm1494_vm6, %vm1495_vm5  ;;  %v1515_v45 = vand.u32 2147483648, %v3298_v31  ;;  %vm1509_vm10 = vweird.f32 %v3298_v31 }
 0x1c5   :  { %v1070_v0 = vpop.f32.mrf.mxu1  ;;  %v1491_v12 = vsub.f32 1.0, %v1490_v32  ;;  %v1513_v2 = vand.u32 2147483647, %v3298_v31 }
 0x1c6   :  { %v1071_v20 = vadd.f32 %v3161_v28, %v1070_v0  ;;  %v1516_v6 = vor.u32 1.1754944e-38, %v1515_v45 }
 0x1c7   :  { %v1492_v5 = vmul.f32 %v2292_v49, %v1491_v12  ;;  %vm1514_vm12 = vcmp.eq.f32.partialorder %v1513_v2, 8.507059e+37 }
 0x1c8   :  { %v1126_v34 = vsub.f32 0.0, %v1071_v20  ;;  %v1839_v35 = vpop.f32.mrf.mxu2 }
 0x1c9   :  { %v2294_v37 = vpop.eup %2293  ;;  %v1840_v41 = vadd.f32 %v3306_v33, %v1839_v35  ;;  %v1493_v58 = vadd.f32 %v2292_v49, %v1492_v5 }
 0x1ca   :  { %v2296_v30 = vpop.eup %2295  ;;  %v3310_v40 = vadd.f32 1.0, %v2294_v37  ;;  %v1178_v43 = vmul.f32 1.442695, %v1126_v34 }
 0x1cb   :  { %2052 = vmatmul.msk.f32.gmra.mxu2 %vm896_vm4, %v1487_v55  ;;  %1936 = vst.msk [vmem:[%s3517_s7] sm:$0xff] %vm1935_vm3, %v1840_v41  ;;  %v1505_v14 = vmul.f32 %v2296_v30, %v3298_v31  ;;  %v1497_v57 = vsel %vm1496_vm7, %v2292_v49, %v1493_v58  ;;  %vm1510_vm9 = vweird.f32 %v2296_v30 }
 0x1cc   :  { %2297 = vrcp.f32 %v3310_v40  ;;  %v1502_v24 = vsel %vm1499_vm8, %v1501_v50, %v1497_v57  ;;  %vm1511_vm11 = vmor %vm1509_vm10, %vm1510_vm9  ;;  %v1530_v16 = vand.u32 2147483648, %v3310_v40  ;;  %vm1524_vm14 = vweird.f32 %v3310_v40 }
 0x1cd   :  { %2299 = vpow2.f32 %v1178_v43  ;;  %v1073_v3 = vpop.f32.mrf.mxu1  ;;  %v1506_v47 = vsub.f32 1.0, %v1505_v14  ;;  %v1528_v59 = vand.u32 2147483647, %v3310_v40 }
 0x1ce   :  { %v1074_v48 = vadd.f32 %v3161_v28, %v1073_v3  ;;  %v1531_v60 = vor.u32 1.1754944e-38, %v1530_v16 }
 0x1cf   :  { %v1507_v51 = vmul.f32 %v2296_v30, %v1506_v47  ;;  %vm1529_vm0 = vcmp.eq.f32.partialorder %v1528_v59, 8.507059e+37 }
 0x1d0   :  { %v1127_v52 = vsub.f32 0.0, %v1074_v48  ;;  %v1842_v54 = vpop.f32.mrf.mxu2 }
 0x1d1   :  { %v1843_v53 = vadd.f32 %v3306_v33, %v1842_v54  ;;  %v1508_v63 = vadd.f32 %v2296_v30, %v1507_v51 }
 0x1d2   :  { %v2298_v62 = vpop.eup %2297  ;;  %v1180_v39 = vmul.f32 1.442695, %v1127_v52 }
 0x1d3   :  { %v2300_v1 = vpop.eup %2299  ;;  %2053 = vmatmul.msk.f32.gmra.mxu2 %vm896_vm4, %v1502_v24  ;;  %1937 = vst.msk [vmem:[%s3517_s7 + $0x8] sm:$0xff] %vm1935_vm3, %v1843_v53  ;;  %v1520_v9 = vmul.f32 %v2298_v62, %v3310_v40  ;;  %v1512_v22 = vsel %vm1511_vm11, %v2296_v30, %v1508_v63  ;;  %vm1525_vm13 = vweird.f32 %v2298_v62 }
 0x1d4   :  { %v1222_v4 = vadd.f32 1.0, %v2300_v1  ;;  %2301 = vpow2.f32 %v1180_v39  ;;  %v1517_v56 = vsel %vm1514_vm12, %v1516_v6, %v1512_v22  ;;  %vm1526_vm15 = vmor %vm1524_vm14, %vm1525_vm13 }
 0x1d5   :  { %v1521_v42 = vsub.f32 1.0, %v1520_v9 }
 0x1d6   :  { %2303 = vrcp.f32 %v1222_v4  ;;  %v1545_v36 = vand.u32 2147483648, %v1222_v4  ;;  %vm1539_vm2 = vweird.f32 %v1222_v4  ;;  %v1543_v20 = vand.u32 2147483647, %v1222_v4 }
 0x1d7   :  { %v1076_v8 = vpop.f32.mrf.mxu1  ;;  %v1522_v7 = vmul.f32 %v2298_v62, %v1521_v42 }
 0x1d8   :  { %v1077_v61 = vadd.f32 %v3161_v28, %v1076_v8  ;;  %v1546_v41 = vor.u32 1.1754944e-38, %v1545_v36  ;;  %vm1544_vm6 = vcmp.eq.f32.partialorder %v1543_v20, 8.507059e+37 }
 0x1d9   :  { %v1523_v10 = vadd.f32 %v2298_v62, %v1522_v7 }
 0x1da   :  { %v2302_v13 = vpop.eup %2301  ;;  %v1128_v15 = vsub.f32 0.0, %v1077_v61  ;;  %v1845_v44 = vpop.f32.mrf.mxu2 }
 0x1db   :  { %v1223_v17 = vadd.f32 1.0, %v2302_v13  ;;  %2054 = vmatmul.msk.f32.gmra.mxu2 %vm896_vm4, %v1517_v56  ;;  %v1846_v18 = vadd.f32 %v3306_v33, %v1845_v44  ;;  %v1527_v27 = vsel %vm1526_vm15, %v2298_v62, %v1523_v10 }
 0x1dc   :  { %v2304_v19 = vpop.eup %2303  ;;  %v1182_v25 = vmul.f32 1.442695, %v1128_v15  ;;  %v1532_v49 = vsel %vm1529_vm0, %v1531_v60, %v1527_v27 }
 0x1dd   :  { %2305 = vrcp.f32 %v1223_v17  ;;  %1938 = vst.msk [vmem:[%s3517_s7 + $0x10] sm:$0xff] %vm1935_vm3, %v1846_v18  ;;  %v1535_v23 = vmul.f32 %v2304_v19, %v1222_v4  ;;  %vm1540_vm1 = vweird.f32 %v2304_v19  ;;  %v1560_v26 = vand.u32 2147483648, %v1223_v17 }
 0x1de   :  { %2307 = vpow2.f32 %v1182_v25  ;;  %vm1541_vm5 = vmor %vm1539_vm2, %vm1540_vm1  ;;  %vm1554_vm8 = vweird.f32 %v1223_v17  ;;  %v1558_v3 = vand.u32 2147483647, %v1223_v17 }
 0x1df   :  { %v1536_v29 = vsub.f32 1.0, %v1535_v23  ;;  %v1561_v50 = vor.u32 1.1754944e-38, %v1560_v26 }
 0x1e0   :  { %vm1559_vm10 = vcmp.eq.f32.partialorder %v1558_v3, 8.507059e+37 }
 0x1e1   :  { %v1537_v31 = vmul.f32 %v2304_v19, %v1536_v29 }
 0x1e2   :  { %v1079_v11 = vpop.f32.mrf.mxu1 }
 0x1e3   :  { %v2306_v32 = vpop.eup %2305  ;;  %v1080_v0 = vadd.f32 %v3161_v28, %v1079_v11  ;;  %2055 = vmatmul.msk.f32.gmra.mxu2 %vm896_vm4, %v1532_v49  ;;  %v1848_v21 = vpop.f32.mrf.mxu2  ;;  %v1538_v12 = vadd.f32 %v2304_v19, %v1537_v31 }
 0x1e4   :  { %v2308_v38 = vpop.eup %2307  ;;  %v1849_v5 = vadd.f32 %v3306_v33, %v1848_v21  ;;  %v1550_v34 = vmul.f32 %v2306_v32, %v1223_v17  ;;  %vm1555_vm7 = vweird.f32 %v2306_v32 }
 0x1e5   :  { %v1224_v55 = vadd.f32 1.0, %v2308_v38  ;;  %v1129_v35 = vsub.f32 0.0, %v1080_v0  ;;  %v1542_v37 = vsel %vm1541_vm5, %v2304_v19, %v1538_v12  ;;  %vm1556_vm9 = vmor %vm1554_vm8, %vm1555_vm7 }
 0x1e6   :  { %1939 = vst.msk [vmem:[%s3517_s7 + $0x18] sm:$0xff] %vm1935_vm3, %v1849_v5  ;;  %v1551_v58 = vsub.f32 1.0, %v1550_v34  ;;  %v1547_v40 = vsel %vm1544_vm6, %v1546_v41, %v1542_v37 }
 0x1e7   :  { %2309 = vrcp.f32 %v1224_v55  ;;  %v1184_v30 = vmul.f32 1.442695, %v1129_v35  ;;  %v1575_v62 = vand.u32 2147483648, %v1224_v55  ;;  %v1573_v1 = vand.u32 2147483647, %v1224_v55 }
 0x1e8   :  { %v1552_v43 = vmul.f32 %v2306_v32, %v1551_v58  ;;  %vm1569_vm12 = vweird.f32 %v1224_v55 }
 0x1e9   :  { %2311 = vpow2.f32 %v1184_v30  ;;  %v1576_v8 = vor.u32 1.1754944e-38, %v1575_v62  ;;  %vm1574_vm14 = vcmp.eq.f32.partialorder %v1573_v1, 8.507059e+37 }
 0x1ea   :  { %v1553_v46 = vadd.f32 %v2306_v32, %v1552_v43 }
 0x1eb   :  { %2056 = vmatmul.msk.f32.gmra.mxu2 %vm896_vm4, %v1547_v40  ;;  %v1851_v14 = vpop.f32.mrf.mxu2 }
 0x1ec   :  { %v1852_v57 = vadd.f32 %v3306_v33, %v1851_v14  ;;  %v1557_v48 = vsel %vm1556_vm9, %v2306_v32, %v1553_v46 }
 0x1ed   :  { %v2310_v47 = vpop.eup %2309  ;;  %v1562_v54 = vsel %vm1559_vm10, %v1561_v50, %v1557_v48 }
 0x1ee   :  { %1940 = vst.msk [vmem:[%s3517_s7 + $0x20] sm:$0xff] %vm1935_vm3, %v1852_v57  ;;  %v1565_v51 = vmul.f32 %v2310_v47, %v1224_v55  ;;  %vm1570_vm11 = vweird.f32 %v2310_v47 }
 0x1ef   :  { %v2312_v52 = vpop.eup %2311  ;;  %vm1571_vm13 = vmor %vm1569_vm12, %vm1570_vm11 }
 0x1f0   :  { %v1225_v24 = vadd.f32 1.0, %v2312_v52  ;;  %v1566_v53 = vsub.f32 1.0, %v1565_v51 }
 0x1f1   :  { %v1082_v63 = vpop.f32.mrf.mxu3 }
 0x1f2   :  { %2313 = vrcp.f32 %v1225_v24  ;;  %v1083_v39 = vadd.f32 %v3161_v28, %v1082_v63  ;;  %v1567_v45 = vmul.f32 %v2310_v47, %v1566_v53  ;;  %v1590_v16 = vand.u32 2147483648, %v1225_v24 }
 0x1f3   :  { %2057 = vmatmul.msk.f32.gmra.mxu2 %vm896_vm4, %v1562_v54  ;;  %v1588_v18 = vand.u32 2147483647, %v1225_v24  ;;  %vm1584_vm0 = vweird.f32 %v1225_v24 }
 0x1f4   :  { %v1130_v2 = vsub.f32 0.0, %v1083_v39  ;;  %v1854_v9 = vpop.f32.mrf.mxu2  ;;  %v1568_v4 = vadd.f32 %v2310_v47, %v1567_v45  ;;  %v1591_v29 = vor.u32 1.1754944e-38, %v1590_v16 }
 0x1f5   :  { %v1855_v22 = vadd.f32 %v3306_v33, %v1854_v9  ;;  %vm1589_vm2 = vcmp.eq.f32.partialorder %v1588_v18, 8.507059e+37 }
 0x1f6   :  { %v1186_v42 = vmul.f32 1.442695, %v1130_v2  ;;  %v1572_v6 = vsel %vm1571_vm13, %v2310_v47, %v1568_v4 }
 0x1f7   :  { %1941 = vst.msk [vmem:[%s3517_s7 + $0x28] sm:$0xff] %vm1935_vm3, %v1855_v22  ;;  %v1577_v61 = vsel %vm1574_vm14, %v1576_v8, %v1572_v6 }
 0x1f8   :  { %v2314_v7 = vpop.eup %2313  ;;  %2315 = vpow2.f32 %v1186_v42 }
 0x1f9   :  { %v1085_v56 = vpop.f32.mrf.mxu3  ;;  %v1580_v10 = vmul.f32 %v2314_v7, %v1225_v24  ;;  %vm1585_vm15 = vweird.f32 %v2314_v7 }
 0x1fa   :  { %v1086_v13 = vadd.f32 %v3161_v28, %v1085_v56  ;;  %vm1586_vm1 = vmor %vm1584_vm0, %vm1585_vm15 }
 0x1fb   :  { %2058 = vmatmul.msk.f32.gmra.mxu2 %vm896_vm4, %v1577_v61  ;;  %v1581_v15 = vsub.f32 1.0, %v1580_v10 }
 0x1fc   :  { %v1131_v44 = vsub.f32 0.0, %v1086_v13 }
 0x1fd   :  { %v1582_v17 = vmul.f32 %v2314_v7, %v1581_v15 }
 0x1fe   :  { %v2316_v59 = vpop.eup %2315  ;;  %v1188_v19 = vmul.f32 1.442695, %v1131_v44  ;;  %v1857_v25 = vpop.f32.mrf.mxu2 }
 0x1ff   :  { %v1226_v27 = vadd.f32 1.0, %v2316_v59  ;;  %v1858_v23 = vadd.f32 %v3306_v33, %v1857_v25  ;;  %v1583_v60 = vadd.f32 %v2314_v7, %v1582_v17 }
 0x200   :  { %2317 = vpow2.f32 %v1188_v19 }
 0x201   :  { %2319 = vrcp.f32 %v1226_v27  ;;  %1942 = vst.msk [vmem:[%s3517_s7 + $0x30] sm:$0xff] %vm1935_vm3, %v1858_v23  ;;  %v1587_v49 = vsel %vm1586_vm1, %v2314_v7, %v1583_v60  ;;  %v1605_v37 = vand.u32 2147483648, %v1226_v27  ;;  %v1603_v30 = vand.u32 2147483647, %v1226_v27 }
 0x202   :  { %v1592_v31 = vsel %vm1589_vm2, %v1591_v29, %v1587_v49  ;;  %vm1599_vm6 = vweird.f32 %v1226_v27 }
 0x203   :  { %v1088_v11 = vpop.f32.mrf.mxu3  ;;  %2059 = vmatmul.msk.f32.gmra.mxu2 %vm896_vm4, %v1592_v31  ;;  %v1606_v3 = vor.u32 1.1754944e-38, %v1605_v37  ;;  %vm1604_vm8 = vcmp.eq.f32.partialorder %v1603_v30, 8.507059e+37 }
 0x204   :  { %v1089_v36 = vadd.f32 %v3161_v28, %v1088_v11 }
 0x206   :  { %v2318_v32 = vpop.eup %2317  ;;  %v1132_v0 = vsub.f32 0.0, %v1089_v36  ;;  %v1860_v21 = vpop.f32.mrf.mxu2 }
 0x207   :  { %v2320_v12 = vpop.eup %2319  ;;  %v1227_v20 = vadd.f32 1.0, %v2318_v32  ;;  %v1861_v38 = vadd.f32 %v3306_v33, %v1860_v21 }
 0x208   :  { %v1595_v5 = vmul.f32 %v2320_v12, %v1226_v27  ;;  %v1190_v34 = vmul.f32 1.442695, %v1132_v0  ;;  %vm1600_vm5 = vweird.f32 %v2320_v12 }
 0x209   :  { %2321 = vrcp.f32 %v1227_v20  ;;  %1943 = vst.msk [vmem:[%s3517_s7 + $0x38] sm:$0xff] %vm1935_vm3, %v1861_v38  ;;  %vm1601_vm7 = vmor %vm1599_vm6, %vm1600_vm5  ;;  %v1620_v53 = vand.u32 2147483648, %v1227_v20  ;;  %v1618_v39 = vand.u32 2147483647, %v1227_v20  ;;  %vm1614_vm10 = vweird.f32 %v1227_v20 }
 0x20a   :  { %2323 = vpow2.f32 %v1190_v34  ;;  %v1596_v55 = vsub.f32 1.0, %v1595_v5 }
 0x20b   :  { %v1091_v35 = vpop.f32.mrf.mxu3  ;;  %v1621_v4 = vor.u32 1.1754944e-38, %v1620_v53  ;;  %vm1619_vm12 = vcmp.eq.f32.partialorder %v1618_v39, 8.507059e+37 }
 0x20c   :  { %v1092_v41 = vadd.f32 %v3161_v28, %v1091_v35  ;;  %v1597_v58 = vmul.f32 %v2320_v12, %v1596_v55 }
 0x20e   :  { %v1133_v40 = vsub.f32 0.0, %v1092_v41  ;;  %v1863_v43 = vpop.f32.mrf.mxu2  ;;  %v1598_v46 = vadd.f32 %v2320_v12, %v1597_v58 }
 0x20f   :  { %v2322_v26 = vpop.eup %2321  ;;  %v1864_v14 = vadd.f32 %v3306_v33, %v1863_v43 }
 0x210   :  { %v2324_v57 = vpop.eup %2323  ;;  %v1192_v47 = vmul.f32 1.442695, %v1133_v40  ;;  %v1602_v48 = vsel %vm1601_vm7, %v2320_v12, %v1598_v46  ;;  %v1610_v50 = vmul.f32 %v2322_v26, %v1227_v20  ;;  %vm1615_vm9 = vweird.f32 %v2322_v26 }
 0x211   :  { %v1228_v51 = vadd.f32 1.0, %v2324_v57  ;;  %1944 = vst.msk [vmem:[%s3517_s7 + $0x40] sm:$0xff] %vm1935_vm3, %v1864_v14  ;;  %v1607_v52 = vsel %vm1604_vm8, %v1606_v3, %v1602_v48  ;;  %vm1616_vm11 = vmor %vm1614_vm10, %vm1615_vm9 }
 0x212   :  { %2325 = vpow2.f32 %v1192_v47  ;;  %2060 = vmatmul.msk.f32.vlgmr.msra.gmra.mxu3 %vm896_vm4, %v1607_v52  ;;  %v1611_v24 = vsub.f32 1.0, %v1610_v50 }
 0x213   :  { %2327 = vrcp.f32 %v1228_v51  ;;  %v1094_v54 = vpop.f32.mrf.mxu3  ;;  %v1635_v44 = vand.u32 2147483648, %v1228_v51  ;;  %v1633_v59 = vand.u32 2147483647, %v1228_v51  ;;  %vm1629_vm14 = vweird.f32 %v1228_v51 }
 0x214   :  { %v1095_v63 = vadd.f32 %v3161_v28, %v1094_v54  ;;  %v1612_v62 = vmul.f32 %v2322_v26, %v1611_v24 }
 0x215   :  { %v1636_v49 = vor.u32 1.1754944e-38, %v1635_v44  ;;  %vm1634_vm0 = vcmp.eq.f32.partialorder %v1633_v59, 8.507059e+37 }
 0x216   :  { %v1134_v45 = vsub.f32 0.0, %v1095_v63  ;;  %v1866_v1 = vpop.f32.mrf.mxu2  ;;  %v1613_v2 = vadd.f32 %v2322_v26, %v1612_v62 }
 0x217   :  { %v1867_v9 = vadd.f32 %v3306_v33, %v1866_v1 }
 0x218   :  { %v2326_v22 = vpop.eup %2325  ;;  %v1194_v42 = vmul.f32 1.442695, %v1134_v45  ;;  %v1617_v6 = vsel %vm1616_vm11, %v2322_v26, %v1613_v2 }
 0x219   :  { %v2328_v8 = vpop.eup %2327  ;;  %v1229_v7 = vadd.f32 1.0, %v2326_v22  ;;  %1945 = vst.msk [vmem:[%s3517_s7 + $0x48] sm:$0xff] %vm1935_vm3, %v1867_v9  ;;  %v1622_v61 = vsel %vm1619_vm12, %v1621_v4, %v1617_v6 }
 0x21a   :  { %2329 = vpow2.f32 %v1194_v42  ;;  %2061 = vmatmul.msk.f32.gmra.mxu3 %vm896_vm4, %v1622_v61  ;;  %v1625_v56 = vmul.f32 %v2328_v8, %v1228_v51  ;;  %vm1630_vm13 = vweird.f32 %v2328_v8 }
 0x21b   :  { %2331 = vrcp.f32 %v1229_v7  ;;  %v1097_v10 = vpop.f32.mrf.mxu3  ;;  %vm1631_vm15 = vmor %vm1629_vm14, %vm1630_vm13  ;;  %v1650_v12 = vand.u32 2147483648, %v1229_v7  ;;  %v1648_v34 = vand.u32 2147483647, %v1229_v7  ;;  %vm1644_vm2 = vweird.f32 %v1229_v7 }
 0x21c   :  { %v1098_v13 = vadd.f32 %v3161_v28, %v1097_v10  ;;  %v1626_v15 = vsub.f32 1.0, %v1625_v56 }
 0x21d   :  { %v1651_v40 = vor.u32 1.1754944e-38, %v1650_v12  ;;  %vm1649_vm6 = vcmp.eq.f32.partialorder %v1648_v34, 8.507059e+37 }
 0x21e   :  { %v1135_v16 = vsub.f32 0.0, %v1098_v13  ;;  %v1869_v17 = vpop.f32.mrf.mxu2  ;;  %v1627_v18 = vmul.f32 %v2328_v8, %v1626_v15 }
 0x21f   :  { %v1870_v19 = vadd.f32 %v3306_v33, %v1869_v17 }
 0x220   :  { %v2330_v25 = vpop.eup %2329  ;;  %v1196_v27 = vmul.f32 1.442695, %v1135_v16  ;;  %v1628_v23 = vadd.f32 %v2328_v8, %v1627_v18 }
 0x221   :  { %v2332_v60 = vpop.eup %2331  ;;  %v1230_v29 = vadd.f32 1.0, %v2330_v25  ;;  %1946 = vst.msk [vmem:[%s3517_s7 + $0x50] sm:$0xff] %vm1935_vm3, %v1870_v19 }
 0x222   :  { %2333 = vpow2.f32 %v1196_v27  ;;  %v1632_v31 = vsel %vm1631_vm15, %v2328_v8, %v1628_v23  ;;  %v1640_v11 = vmul.f32 %v2332_v60, %v1229_v7  ;;  %vm1645_vm1 = vweird.f32 %v2332_v60 }
 0x223   :  { %2335 = vrcp.f32 %v1230_v29  ;;  %v1100_v36 = vpop.f32.mrf.mxu3  ;;  %v1637_v32 = vsel %vm1634_vm0, %v1636_v49, %v1632_v31  ;;  %vm1646_vm5 = vmor %vm1644_vm2, %vm1645_vm1  ;;  %v1665_v47 = vand.u32 2147483648, %v1230_v29  ;;  %v1663_v52 = vand.u32 2147483647, %v1230_v29 }
 0x224   :  { %v1101_v0 = vadd.f32 %v3161_v28, %v1100_v36  ;;  %2062 = vmatmul.msk.f32.gmra.mxu3 %vm896_vm4, %v1637_v32  ;;  %v1641_v21 = vsub.f32 1.0, %v1640_v11  ;;  %vm1659_vm8 = vweird.f32 %v1230_v29 }
 0x225   :  { %vm1664_vm10 = vcmp.eq.f32.partialorder %v1663_v52, 8.507059e+37 }
 0x226   :  { %v1136_v20 = vsub.f32 0.0, %v1101_v0  ;;  %v1872_v38 = vpop.f32.mrf.mxu2  ;;  %v1642_v5 = vmul.f32 %v2332_v60, %v1641_v21 }
 0x227   :  { %v1873_v55 = vadd.f32 %v3306_v33, %v1872_v38 }
 0x228   :  { %v2334_v35 = vpop.eup %2333  ;;  %v1198_v37 = vmul.f32 1.442695, %v1136_v20  ;;  %v1643_v41 = vadd.f32 %v2332_v60, %v1642_v5 }
 0x229   :  { %v2336_v58 = vpop.eup %2335  ;;  %v1231_v30 = vadd.f32 1.0, %v2334_v35  ;;  %1947 = vst.msk [vmem:[%s3517_s7 + $0x58] sm:$0xff] %vm1935_vm3, %v1873_v55 }
 0x22a   :  { %2337 = vpow2.f32 %v1198_v37  ;;  %v1647_v43 = vsel %vm1646_vm5, %v2332_v60, %v1643_v41  ;;  %v1655_v46 = vmul.f32 %v2336_v58, %v1230_v29  ;;  %vm1660_vm7 = vweird.f32 %v2336_v58 }
 0x22b   :  { %2339 = vrcp.f32 %v1231_v30  ;;  %v1103_v26 = vpop.f32.mrf.mxu3  ;;  %v1652_v14 = vsel %vm1649_vm6, %v1651_v40, %v1647_v43  ;;  %vm1661_vm9 = vmor %vm1659_vm8, %vm1660_vm7  ;;  %v1680_v4 = vand.u32 2147483648, %v1231_v30  ;;  %v1678_v6 = vand.u32 2147483647, %v1231_v30 }
 0x22c   :  { %v1104_v3 = vadd.f32 %v3161_v28, %v1103_v26  ;;  %2063 = vmatmul.msk.f32.gmra.mxu3 %vm896_vm4, %v1652_v14  ;;  %v1656_v57 = vsub.f32 1.0, %v1655_v46  ;;  %v1666_v28 = vor.u32 1.1754944e-38, %v1665_v47  ;;  %vm1674_vm12 = vweird.f32 %v1231_v30 }
 0x22d   :  { %v1681_v13 = vor.u32 1.1754944e-38, %v1680_v4  ;;  %vm1679_vm14 = vcmp.eq.f32.partialorder %v1678_v6, 8.507059e+37 }
 0x22e   :  { %v1137_v48 = vsub.f32 0.0, %v1104_v3  ;;  %v1875_v50 = vpop.f32.mrf.mxu2  ;;  %v1657_v51 = vmul.f32 %v2336_v58, %v1656_v57 }
 0x22f   :  { %v1876_v24 = vadd.f32 %v3306_v33, %v1875_v50 }
 0x230   :  { %v2338_v54 = vpop.eup %2337  ;;  %v1200_v53 = vmul.f32 1.442695, %v1137_v48  ;;  %v1658_v63 = vadd.f32 %v2336_v58, %v1657_v51 }
 0x231   :  { %v2340_v62 = vpop.eup %2339  ;;  %v1232_v39 = vadd.f32 1.0, %v2338_v54  ;;  %1948 = vst.msk [vmem:[%s3517_s7 + $0x60] sm:$0xff] %vm1935_vm3, %v1876_v24 }
 0x232   :  { %2341 = vpow2.f32 %v1200_v53  ;;  %v1662_v45 = vsel %vm1661_vm9, %v2336_v58, %v1658_v63  ;;  %v1670_v1 = vmul.f32 %v2340_v62, %v1231_v30  ;;  %vm1675_vm11 = vweird.f32 %v2340_v62 }
 0x233   :  { %2343 = vrcp.f32 %v1232_v39  ;;  %v1667_v2 = vsel %vm1664_vm10, %v1666_v28, %v1662_v45  ;;  %vm1676_vm13 = vmor %vm1674_vm12, %vm1675_vm11  ;;  %v1695_v18 = vand.u32 2147483648, %v1232_v39  ;;  %v1693_v25 = vand.u32 2147483647, %v1232_v39 }
 0x234   :  { %2064 = vmatmul.msk.f32.gmra.mxu3 %vm896_vm4, %v1667_v2  ;;  %v1671_v9 = vsub.f32 1.0, %v1670_v1  ;;  %vm1689_vm0 = vweird.f32 %v1232_v39 }
 0x235   :  { %v1696_v29 = vor.u32 1.1754944e-38, %v1695_v18  ;;  %vm1694_vm2 = vcmp.eq.f32.partialorder %v1693_v25, 8.507059e+37 }
 0x236   :  { %v1878_v22 = vpop.f32.mrf.mxu2  ;;  %v1672_v42 = vmul.f32 %v2340_v62, %v1671_v9 }
 0x237   :  { %v1879_v8 = vadd.f32 %v3306_v33, %v1878_v22 }
 0x238   :  { %v2342_v7 = vpop.eup %2341  ;;  %v1673_v61 = vadd.f32 %v2340_v62, %v1672_v42 }
 0x239   :  { %v2344_v56 = vpop.eup %2343  ;;  %v1233_v10 = vadd.f32 1.0, %v2342_v7  ;;  %1949 = vst.msk [vmem:[%s3517_s7 + $0x68] sm:$0xff] %vm1935_vm3, %v1879_v8 }
 0x23a   :  { %v1677_v15 = vsel %vm1676_vm13, %v2340_v62, %v1673_v61  ;;  %v1685_v44 = vmul.f32 %v2344_v56, %v1232_v39  ;;  %vm1690_vm15 = vweird.f32 %v2344_v56 }
 0x23b   :  { %2345 = vrcp.f32 %v1233_v10  ;;  %v1682_v16 = vsel %vm1679_vm14, %v1681_v13, %v1677_v15  ;;  %vm1691_vm1 = vmor %vm1689_vm0, %vm1690_vm15  ;;  %v1710_v32 = vand.u32 2147483648, %v1233_v10  ;;  %v1708_v12 = vand.u32 2147483647, %v1233_v10 }
 0x23c   :  { %2065 = vmatmul.msk.f32.gmra.mxu3 %vm896_vm4, %v1682_v16  ;;  %v1686_v17 = vsub.f32 1.0, %v1685_v44  ;;  %vm1704_vm6 = vweird.f32 %v1233_v10 }
 0x23d   :  { %v1711_v5 = vor.u32 1.1754944e-38, %v1710_v32  ;;  %vm1709_vm8 = vcmp.eq.f32.partialorder %v1708_v12, 8.507059e+37 }
 0x23e   :  { %v1881_v59 = vpop.f32.mrf.mxu2  ;;  %v1687_v19 = vmul.f32 %v2344_v56, %v1686_v17 }
 0x23f   :  { %v1882_v27 = vadd.f32 %v3306_v33, %v1881_v59 }
 0x240   :  { %v1688_v23 = vadd.f32 %v2344_v56, %v1687_v19 }
 0x241   :  { %v2346_v60 = vpop.eup %2345  ;;  %1950 = vst.msk [vmem:[%s3517_s7 + $0x70] sm:$0xff] %vm1935_vm3, %v1882_v27 }
 0x242   :  { %v1692_v49 = vsel %vm1691_vm1, %v2344_v56, %v1688_v23  ;;  %v1700_v31 = vmul.f32 %v2346_v60, %v1233_v10  ;;  %vm1705_vm5 = vweird.f32 %v2346_v60 }
 0x243   :  { %v1697_v11 = vsel %vm1694_vm2, %v1696_v29, %v1692_v49  ;;  %vm1706_vm7 = vmor %vm1704_vm6, %vm1705_vm5 }
 0x244   :  { %2066 = vmatmul.msk.f32.gmra.mxu3 %vm896_vm4, %v1697_v11  ;;  %v1701_v36 = vsub.f32 1.0, %v1700_v31 }
 0x246   :  { %v1884_v0 = vpop.f32.mrf.mxu2  ;;  %v1702_v21 = vmul.f32 %v2346_v60, %v1701_v36 }
 0x247   :  { %v1885_v20 = vadd.f32 %v3306_v33, %v1884_v0 }
 0x248   :  { %v1703_v38 = vadd.f32 %v2346_v60, %v1702_v21 }
 0x249   :  { %1951 = vst.msk [vmem:[%s3517_s7 + $0x78] sm:$0xff] %vm1935_vm3, %v1885_v20 }
 0x24a   :  { %v1707_v34 = vsel %vm1706_vm7, %v2346_v60, %v1703_v38 }
 0x24b   :  { %v1712_v55 = vsel %vm1709_vm8, %v1711_v5, %v1707_v34 }
 0x24c   :  { %2067 = vmatmul.msk.f32.gmra.mxu3 %vm896_vm4, %v1712_v55 }
 0x24e   :  { %v1887_v35 = vpop.f32.mrf.mxu2 }
 0x24f   :  { %v1888_v37 = vadd.f32 %v3306_v33, %v1887_v35 }
 0x251   :  { %1952 = vst.msk [vmem:[%s3517_s7 + $0x80] sm:$0xff] %vm1935_vm3, %v1888_v37 }
 0x256   :  { %v1890_v41 = vpop.f32.mrf.mxu2 }
 0x257   :  { %v1891_v58 = vadd.f32 %v3306_v33, %v1890_v41 }
 0x259   :  { %1953 = vst.msk [vmem:[%s3517_s7 + $0x88] sm:$0xff] %vm1935_vm3, %v1891_v58 }
 0x25e   :  { %v1893_v30 = vpop.f32.mrf.mxu2 }
 0x25f   :  { %v1894_v40 = vadd.f32 %v3306_v33, %v1893_v30 }
 0x261   :  { %1954 = vst.msk [vmem:[%s3517_s7 + $0x90] sm:$0xff] %vm1935_vm3, %v1894_v40 }
 0x266   :  { %v1896_v43 = vpop.f32.mrf.mxu2 }
 0x267   :  { %v1897_v46 = vadd.f32 %v3306_v33, %v1896_v43 }
 0x269   :  { %1955 = vst.msk [vmem:[%s3517_s7 + $0x98] sm:$0xff] %vm1935_vm3, %v1897_v46 }
 0x26e   :  { %v1899_v26 = vpop.f32.mrf.mxu2 }
 0x26f   :  { %v1900_v14 = vadd.f32 %v3306_v33, %v1899_v26 }
 0x271   :  { %1956 = vst.msk [vmem:[%s3517_s7 + $0xa0] sm:$0xff] %vm1935_vm3, %v1900_v14 }
 0x276   :  { %v1902_v3 = vpop.f32.mrf.mxu2 }
 0x277   :  { %v1903_v57 = vadd.f32 %v3306_v33, %v1902_v3 }
 0x279   :  { %1957 = vst.msk [vmem:[%s3517_s7 + $0xa8] sm:$0xff] %vm1935_vm3, %v1903_v57 }
 0x27e   :  { %v1905_v47 = vpop.f32.mrf.mxu2 }
 0x27f   :  { %v1906_v48 = vadd.f32 %v3306_v33, %v1905_v47 }
 0x281   :  { %1958 = vst.msk [vmem:[%s3517_s7 + $0xb0] sm:$0xff] %vm1935_vm3, %v1906_v48 }
 0x286   :  { %v1908_v50 = vpop.f32.mrf.mxu2 }
 0x287   :  { %v1909_v51 = vadd.f32 %v3306_v33, %v1908_v50 }
 0x289   :  { %1959 = vst.msk [vmem:[%s3517_s7 + $0xb8] sm:$0xff] %vm1935_vm3, %v1909_v51 }
 0x295   :  { %v1911_v52 = vpop.f32.mrf.mxu3 }
 0x296   :  { %v1912_v24 = vadd.f32 %v3306_v33, %v1911_v52 }
 0x298   :  { %1960 = vst.msk [vmem:[%s3517_s7 + $0xc0] sm:$0xff] %vm1935_vm3, %v1912_v24 }
 0x29d   :  { %v1914_v54 = vpop.f32.mrf.mxu3 }
 0x29e   :  { %v1915_v53 = vadd.f32 %v3306_v33, %v1914_v54 }
 0x2a0   :  { %1961 = vst.msk [vmem:[%s3517_s7 + $0xc8] sm:$0xff] %vm1935_vm3, %v1915_v53 }
 0x2a7   :  { %v1917_v63 = vpop.f32.mrf.mxu3 }
 0x2a8   :  { %v1918_v62 = vadd.f32 %v3306_v33, %v1917_v63 }
 0x2aa   :  { %1962 = vst.msk [vmem:[%s3517_s7 + $0xd0] sm:$0xff] %vm1935_vm3, %v1918_v62 }
 0x2af   :  { %v1920_v39 = vpop.f32.mrf.mxu3 }
 0x2b0   :  { %v1921_v28 = vadd.f32 %v3306_v33, %v1920_v39 }
 0x2b2   :  { %1963 = vst.msk [vmem:[%s3517_s7 + $0xd8] sm:$0xff] %vm1935_vm3, %v1921_v28 }
 0x2b7   :  { %v1923_v45 = vpop.f32.mrf.mxu3 }
 0x2b8   :  { %v1924_v1 = vadd.f32 %v3306_v33, %v1923_v45 }
 0x2ba   :  { %1964 = vst.msk [vmem:[%s3517_s7 + $0xe0] sm:$0xff] %vm1935_vm3, %v1924_v1 }
 0x2bf   :  { %v1926_v2 = vpop.f32.mrf.mxu3 }
 0x2c0   :  { %v1927_v9 = vadd.f32 %v3306_v33, %v1926_v2 }
 0x2c2   :  { %1965 = vst.msk [vmem:[%s3517_s7 + $0xe8] sm:$0xff] %vm1935_vm3, %v1927_v9 }
 0x2c7   :  { %v1929_v4 = vpop.f32.mrf.mxu3 }
 0x2c8   :  { %v1930_v22 = vadd.f32 %v3306_v33, %v1929_v4 }
 0x2ca   :  { %1966 = vst.msk [vmem:[%s3517_s7 + $0xf0] sm:$0xff] %vm1935_vm3, %v1930_v22 }
 0x2cf   :  { %v1932_v42 = vpop.f32.mrf.mxu3 }
 0x2d0   :  { %v1933_v6 = vadd.f32 %v3306_v33, %v1932_v42 }
 0x2d2   :  { %1967 = vst.msk [vmem:[%s3517_s7 + $0xf8] sm:$0xff] %vm1935_vm3, %v1933_v6 }

</bundles_post_ra>
